<compile_context>
chip_gen: v6e
topology: v6e:2x2x1
jax: 0.10.0
libtpu: 0.0.40
codegen_flags: <defaults>
</compile_context>

<pallas_src>
import functools
import math

import jax
import jax.numpy as jnp
from jax.experimental import pallas as pl
from jax.experimental.pallas import tpu as pltpu


def _self_attention_kernel(x_ref, mask_ref, wq_ref, wk_ref, wv_ref,
                           bq_ref, bk_ref, bv_ref, o_ref, ctx_ref,
                           *, num_heads, head_dim, seq_len, block_batch):
    # x_ref:    (block_batch*S, H) rows in the MXU compute dtype (bf16 or f32)
    # mask_ref: (block_batch, 1, S) additive attention mask (f32)
    # w*_ref:   (H_in, H_out) pre-transposed weights (compute dtype)
    # b*_ref:   (1, H) f32 biases
    # ctx_ref:  (block_batch*S, H) f32 VMEM scratch for the merged heads
    x = x_ref[...]
    cdt = x.dtype                                     # MXU input dtype
    mask = mask_ref[...]                              # (TB, 1, S) f32

    scale = jnp.float32(1.0 / math.sqrt(head_dim))

    # Fused QKV projections for the whole row slab; f32 accumulation on the
    # MXU, inputs stay in their (possibly bf16) native dtype.
    q = jnp.dot(x, wq_ref[...], preferred_element_type=jnp.float32)
    q = (q + bq_ref[...]) * scale                     # fold 1/sqrt(hd) once
    k = jnp.dot(x, wk_ref[...], preferred_element_type=jnp.float32)
    k = k + bk_ref[...]
    v = jnp.dot(x, wv_ref[...], preferred_element_type=jnp.float32)
    v = v + bv_ref[...]

    for tb in range(block_batch):                     # static unroll (batch)
        r0 = tb * seq_len
        m_b = mask[tb]                                # (1, S) -> bcast over queries
        for h in range(num_heads):                    # static unroll (heads)
            lo = h * head_dim
            q_h = q[r0:r0 + seq_len, lo:lo + head_dim].astype(cdt)
            k_h = k[r0:r0 + seq_len, lo:lo + head_dim].astype(cdt)
            v_h = v[r0:r0 + seq_len, lo:lo + head_dim].astype(cdt)

            # scores = q_h @ k_h^T (contract head dims), f32 accumulation.
            s = jax.lax.dot_general(q_h, k_h, (((1,), (1,)), ((), ())),
                                    preferred_element_type=jnp.float32)
            s = s + m_b

            # Numerically-stable softmax; normalization deferred to the
            # (S, head_dim) context so the (S, S) tile never sees a divide.
            m = jnp.max(s, axis=-1, keepdims=True)
            p = jnp.exp(s - m)
            l = jnp.sum(p, axis=-1, keepdims=True)
            # TODO(synk): attention_probs dropout omitted (eval / inference mode).
            ctx_h = jnp.dot(p.astype(cdt), v_h,
                            preferred_element_type=jnp.float32)
            inv_l = pl.reciprocal(l, approx=True)     # EUP slot (nearly free)
            ctx_ref[r0:r0 + seq_len, lo:lo + head_dim] = ctx_h * inv_l

    # Single lane-dense store of the merged-head (rows, H) tile.
    o_ref[...] = ctx_ref[...].astype(o_ref.dtype)


def _default_block_batch(batch, seq, target_rows=128):
    """Largest divisor of `batch` whose row slab is <= target_rows, preferring
    (a) >= 2 grid steps (feeds v7x's two TensorCores) and (b) 8-row-aligned
    slabs so the (8, 128) block tiling constraint is satisfied."""
    divisors = [d for d in range(1, batch + 1) if batch % d == 0]
    pool = [d for d in divisors if d * seq <= max(target_rows, seq)] or [1]
    multi = [d for d in pool if batch // d >= 2]
    if multi:
        pool = multi
    aligned = [d for d in pool if (d * seq) % 8 == 0 or batch // d == 1]
    if aligned:
        return max(aligned)
    return batch  # full-array block always satisfies the tiling constraint


def _vmem_limit_bytes(block_rows, block_batch, seq, hidden, head_dim,
                      in_itemsize, out_itemsize):
    """Explicit scoped-VMEM budget from the buffer sum (+2x headroom)."""
    f32 = 4
    x_bufs = 2 * block_rows * hidden * in_itemsize        # double-buffered input
    out_bufs = 2 * block_rows * hidden * out_itemsize     # double-buffered output
    mask_bufs = 2 * block_batch * seq * f32
    weights = 1 * 3 * hidden * hidden * in_itemsize       # Buffered(1) residents
    biases = 1 * 3 * hidden * f32
    scratch = block_rows * hidden * f32                    # merged-head ctx scratch
    interm = 3 * block_rows * hidden * f32                 # q / k / v in f32
    interm += seq * seq * f32 + seq * head_dim * f32       # per-head scores / ctx
    est = x_bufs + out_bufs + mask_bufs + weights + biases + scratch + interm
    # Floor at the 32 MiB scoped default, cap at v7x's 64 MiB physical VMEM.
    return int(min(max(2 * est, 32 * 1024 * 1024), 64 * 1024 * 1024))


def _const_spec(shape, single_buffer):
    """BlockSpec for an operand whose block never changes across the grid."""
    index_map = lambda b: (0,) * len(shape)
    if single_buffer:
        # Constant index_map => keep ONE resident VMEM copy instead of the
        # default double-buffer (halves resident weight footprint).
        return pl.BlockSpec(shape, index_map, pipeline_mode=pl.Buffered(1))
    return pl.BlockSpec(shape, index_map)


def bert_self_attention(hidden_states, attention_mask,
                        wq, bq, wk, bk, wv, bv, *,
                        num_heads, compute_dtype=None, block_batch=None):
    """hidden_states: (B, S, H); attention_mask: (B, 1, 1, S) additive mask.

    w*: (H_out, H_in) PyTorch Linear layout; b*: (H,).
    compute_dtype: dtype fed to the MXU (e.g. jnp.bfloat16); accumulation and
    softmax stay f32.  Returns (context_layer, attn_data) with attn_data=None
    (config.visualization == False).
    """
    B, S, H = hidden_states.shape
    if H % num_heads:
        raise ValueError("hidden size must be a multiple of num_heads")
    head_dim = H // num_heads
    out_dtype = hidden_states.dtype
    cdt = jnp.dtype(compute_dtype) if compute_dtype is not None else jnp.dtype(out_dtype)

    if block_batch is None:
        block_batch = _default_block_batch(B, S)
    if B % block_batch:
        raise ValueError("block_batch must divide the batch size")
    block_rows = block_batch * S
    grid = (B // block_batch,)

    x2d = hidden_states.reshape(B * S, H).astype(cdt)
    mask3d = attention_mask.reshape(B, 1, S).astype(jnp.float32)
    # Pre-transpose the PyTorch (out, in) weights once in the wrapper so the
    # kernel's dots are plain (rows, H) @ (H, H) contractions.
    wq_t = wq.T.astype(cdt)
    wk_t = wk.T.astype(cdt)
    wv_t = wv.T.astype(cdt)
    bq2 = bq.reshape(1, H).astype(jnp.float32)
    bk2 = bk.reshape(1, H).astype(jnp.float32)
    bv2 = bv.reshape(1, H).astype(jnp.float32)

    kernel = functools.partial(_self_attention_kernel,
                               num_heads=num_heads, head_dim=head_dim,
                               seq_len=S, block_batch=block_batch)
    vmem_limit = _vmem_limit_bytes(block_rows, block_batch, S, H, head_dim,
                                   jnp.dtype(cdt).itemsize,
                                   jnp.dtype(out_dtype).itemsize)

    def build(single_buffer_weights):
        w_spec = _const_spec((H, H), single_buffer_weights)
        b_spec = _const_spec((1, H), single_buffer_weights)
        return pl.pallas_call(
            kernel,
            out_shape=jax.ShapeDtypeStruct((B * S, H), out_dtype),
            grid_spec=pltpu.PrefetchScalarGridSpec(
                num_scalar_prefetch=0,
                grid=grid,
                in_specs=[
                    pl.BlockSpec((block_rows, H), lambda b: (b, 0)),        # x rows
                    pl.BlockSpec((block_batch, 1, S), lambda b: (b, 0, 0)),  # mask
                    w_spec, w_spec, w_spec,                                  # Wq^T Wk^T Wv^T
                    b_spec, b_spec, b_spec,                                  # bq bk bv
                ],
                out_specs=pl.BlockSpec((block_rows, H), lambda b: (b, 0)),
                scratch_shapes=[pltpu.VMEM((block_rows, H), jnp.float32)],
            ),
            compiler_params=pltpu.CompilerParams(
                dimension_semantics=("parallel",),
                vmem_limit_bytes=vmem_limit),
        )

    args = (x2d, mask3d, wq_t, wk_t, wv_t, bq2, bk2, bv2)
    try:
        out = build(single_buffer_weights=True)(*args)
    except Exception:
        # Graceful fallback for environments where BlockSpec(pipeline_mode=
        # pl.Buffered(1)) is unavailable; the kernel itself is unchanged.
        out = build(single_buffer_weights=False)(*args)

    context_layer = out.reshape(B, S, H)
    attn_data = None   # config.visualization == False
    return context_layer, attn_data


def _reference(x, mask, wq, bq, wk, bk, wv, bv, num_heads):
    """Pure-JAX mirror of the PyTorch forward (eval mode, no dropout)."""
    B, S, H = x.shape
    hd = H // num_heads
    hp = jax.lax.Precision.HIGHEST
    q = jnp.einsum("bsi,oi->bso", x, wq, precision=hp) + bq
    k = jnp.einsum("bsi,oi->bso", x, wk, precision=hp) + bk
    v = jnp.einsum("bsi,oi->bso", x, wv, precision=hp) + bv
    q = q.reshape(B, S, num_heads, hd).transpose(0, 2, 1, 3)
    k = k.reshape(B, S, num_heads, hd).transpose(0, 2, 1, 3)
    v = v.reshape(B, S, num_heads, hd).transpose(0, 2, 1, 3)
    s = jnp.einsum("bhqd,bhkd->bhqk", q, k, precision=hp) / math.sqrt(hd)
    s = s + mask                                  # (B,1,1,S) broadcasts
    p = jax.nn.softmax(s, axis=-1)
    ctx = jnp.einsum("bhqk,bhkd->bhqd", p, v, precision=hp)
    return ctx.transpose(0, 2, 1, 3).reshape(B, S, H)


if __name__ == "__main__":
    # config.hidden_size = 32, num_attention_heads = 4; batch=2, seq=8
    B, S, H, NH = 2, 8, 32, 4
    key = jax.random.PRNGKey(0)
    kx, kq, kk, kv, kbq, kbk, kbv = jax.random.split(key, 7)

    x = jax.random.normal(kx, (B, S, H), dtype=jnp.float32)
    # Deterministic synthetic parameters in PyTorch Linear (out, in) layout.
    wq = jax.random.normal(kq, (H, H), dtype=jnp.float32) * 0.02
    wk = jax.random.normal(kk, (H, H), dtype=jnp.float32) * 0.02
    wv = jax.random.normal(kv, (H, H), dtype=jnp.float32) * 0.02
    bq = jax.random.normal(kbq, (H,), dtype=jnp.float32) * 0.02
    bk = jax.random.normal(kbk, (H,), dtype=jnp.float32) * 0.02
    bv = jax.random.normal(kbv, (H,), dtype=jnp.float32) * 0.02

    # Standard BERT additive mask (B, 1, 1, S): 0 for valid tokens, -10000 for
    # padding. Batch 0 keeps all 8 tokens, batch 1 masks its last 2 tokens.
    lengths = jnp.array([8, 6])
    valid = (jnp.arange(S)[None, :] < lengths[:, None]).astype(jnp.float32)
    attention_mask = ((1.0 - valid) * -10000.0).reshape(B, 1, 1, S)

    ref = _reference(x, attention_mask, wq, bq, wk, bk, wv, bv, NH)

    # 1) Native-dtype (f32) MXU path — tight check against the f32 reference
    #    (tolerance accounts for the approximate EUP reciprocal).
    ctx, attn_data = bert_self_attention(x, attention_mask,
                                         wq, bq, wk, bk, wv, bv, num_heads=NH)
    ctx = jax.block_until_ready(ctx)
    assert ctx.shape == (B, S, H)
    assert attn_data is None
    err32 = float(jnp.max(jnp.abs(ctx - ref)))
    assert err32 < 2e-3, f"f32 path max_err={err32}"

    # 2) bf16 MXU path (peak-throughput path on v5e/v6e/v7x) — looser check.
    ctx_bf16, _ = bert_self_attention(x, attention_mask,
                                      wq, bq, wk, bk, wv, bv, num_heads=NH,
                                      compute_dtype=jnp.bfloat16)
    ctx_bf16 = jax.block_until_ready(ctx_bf16)
    err16 = float(jnp.max(jnp.abs(ctx_bf16 - ref)))
    assert err16 < 3e-2, f"bf16 path max_err={err16}"

    print("KERNEL_OK")
</pallas_src>

<mosaic_0001>
module attributes {stable_mosaic.version = 11 : i64} {
  func.func @_self_attention_kernel(%arg0: i32, %arg1: memref<8x32xf32, #tpu.memory_space<vmem>>, %arg2: memref<1x1x8xf32, #tpu.memory_space<vmem>>, %arg3: memref<32x32xf32, #tpu.memory_space<vmem>>, %arg4: memref<32x32xf32, #tpu.memory_space<vmem>>, %arg5: memref<32x32xf32, #tpu.memory_space<vmem>>, %arg6: memref<1x32xf32, #tpu.memory_space<vmem>>, %arg7: memref<1x32xf32, #tpu.memory_space<vmem>>, %arg8: memref<1x32xf32, #tpu.memory_space<vmem>>, %arg9: memref<8x32xf32, #tpu.memory_space<vmem>>, %arg10: memref<8x32xf32, #tpu.memory_space<vmem>>) attributes {dimension_semantics = [#tpu.dimension_semantics<parallel>], iteration_bounds = array<i64: 2>, scalar_prefetch = 0 : i64, scratch_operands = 1 : i64, tpu.core_type = #tpu.core_type<tc>, window_params = [{transform_indices = @transform_0, window_bounds = array<i64: 8, 32>}, {transform_indices = @transform_1, window_bounds = array<i64: 1, 1, 8>}, {pipeline_mode = #tpu.pipeline_mode<synchronous>, transform_indices = @transform_2, window_bounds = array<i64: 32, 32>}, {pipeline_mode = #tpu.pipeline_mode<synchronous>, transform_indices = @transform_3, window_bounds = array<i64: 32, 32>}, {pipeline_mode = #tpu.pipeline_mode<synchronous>, transform_indices = @transform_4, window_bounds = array<i64: 32, 32>}, {pipeline_mode = #tpu.pipeline_mode<synchronous>, transform_indices = @transform_5, window_bounds = array<i64: 1, 32>}, {pipeline_mode = #tpu.pipeline_mode<synchronous>, transform_indices = @transform_6, window_bounds = array<i64: 1, 32>}, {pipeline_mode = #tpu.pipeline_mode<synchronous>, transform_indices = @transform_7, window_bounds = array<i64: 1, 32>}, {transform_indices = @transform_8, window_bounds = array<i64: 8, 32>}]} {
    %c0 = arith.constant 0 : index
    %c0_0 = arith.constant 0 : index
    %0 = vector.load %arg1[%c0, %c0_0] : memref<8x32xf32, #tpu.memory_space<vmem>>, vector<8x32xf32>
    %c0_1 = arith.constant 0 : index
    %c0_2 = arith.constant 0 : index
    %c0_3 = arith.constant 0 : index
    %1 = vector.load %arg2[%c0_1, %c0_2, %c0_3] : memref<1x1x8xf32, #tpu.memory_space<vmem>>, vector<1x1x8xf32>
    %c0_4 = arith.constant 0 : index
    %c0_5 = arith.constant 0 : index
    %2 = vector.load %arg3[%c0_4, %c0_5] : memref<32x32xf32, #tpu.memory_space<vmem>>, vector<32x32xf32>
    %cst = arith.constant dense<0.000000e+00> : vector<8x32xf32>
    %3 = tpu.matmul %0, %2, %cst {dimension_numbers = #tpu.dot_dimension_numbers<[1], [0], [0], [1], [0, 0, 1, 1], [], []>} : vector<8x32xf32>, vector<32x32xf32>, vector<8x32xf32> -> vector<8x32xf32>
    %c0_6 = arith.constant 0 : index
    %c0_7 = arith.constant 0 : index
    %4 = vector.load %arg6[%c0_6, %c0_7] : memref<1x32xf32, #tpu.memory_space<vmem>>, vector<1x32xf32>
    %5 = vector.broadcast %4 : vector<1x32xf32> to vector<8x32xf32>
    %6 = arith.addf %3, %5 : vector<8x32xf32>
    %cst_8 = arith.constant 0.353553385 : f32
    %7 = vector.broadcast %cst_8 : f32 to vector<8x32xf32>
    %8 = arith.mulf %6, %7 : vector<8x32xf32>
    %c0_9 = arith.constant 0 : index
    %c0_10 = arith.constant 0 : index
    %9 = vector.load %arg4[%c0_9, %c0_10] : memref<32x32xf32, #tpu.memory_space<vmem>>, vector<32x32xf32>
    %cst_11 = arith.constant dense<0.000000e+00> : vector<8x32xf32>
    %10 = tpu.matmul %0, %9, %cst_11 {dimension_numbers = #tpu.dot_dimension_numbers<[1], [0], [0], [1], [0, 0, 1, 1], [], []>} : vector<8x32xf32>, vector<32x32xf32>, vector<8x32xf32> -> vector<8x32xf32>
    %c0_12 = arith.constant 0 : index
    %c0_13 = arith.constant 0 : index
    %11 = vector.load %arg7[%c0_12, %c0_13] : memref<1x32xf32, #tpu.memory_space<vmem>>, vector<1x32xf32>
    %12 = vector.broadcast %11 : vector<1x32xf32> to vector<8x32xf32>
    %13 = arith.addf %10, %12 : vector<8x32xf32>
    %c0_14 = arith.constant 0 : index
    %c0_15 = arith.constant 0 : index
    %14 = vector.load %arg5[%c0_14, %c0_15] : memref<32x32xf32, #tpu.memory_space<vmem>>, vector<32x32xf32>
    %cst_16 = arith.constant dense<0.000000e+00> : vector<8x32xf32>
    %15 = tpu.matmul %0, %14, %cst_16 {dimension_numbers = #tpu.dot_dimension_numbers<[1], [0], [0], [1], [0, 0, 1, 1], [], []>} : vector<8x32xf32>, vector<32x32xf32>, vector<8x32xf32> -> vector<8x32xf32>
    %c0_17 = arith.constant 0 : index
    %c0_18 = arith.constant 0 : index
    %16 = vector.load %arg8[%c0_17, %c0_18] : memref<1x32xf32, #tpu.memory_space<vmem>>, vector<1x32xf32>
    %17 = vector.broadcast %16 : vector<1x32xf32> to vector<8x32xf32>
    %18 = arith.addf %15, %17 : vector<8x32xf32>
    %19 = vector.shape_cast %1 : vector<1x1x8xf32> to vector<1x8xf32>
    %20 = vector.extract_strided_slice %8 {offsets = [0, 0], sizes = [8, 8], strides = [1, 1]} : vector<8x32xf32> to vector<8x8xf32>
    %21 = vector.extract_strided_slice %13 {offsets = [0, 0], sizes = [8, 8], strides = [1, 1]} : vector<8x32xf32> to vector<8x8xf32>
    %22 = vector.extract_strided_slice %18 {offsets = [0, 0], sizes = [8, 8], strides = [1, 1]} : vector<8x32xf32> to vector<8x8xf32>
    %cst_19 = arith.constant dense<0.000000e+00> : vector<8x8xf32>
    %23 = tpu.matmul %20, %21, %cst_19 {dimension_numbers = #tpu.dot_dimension_numbers<[1], [1], [0], [0], [0, 0, 1, 0], [], []>} : vector<8x8xf32>, vector<8x8xf32>, vector<8x8xf32> -> vector<8x8xf32>
    %24 = vector.broadcast %19 : vector<1x8xf32> to vector<8x8xf32>
    %25 = arith.addf %23, %24 : vector<8x8xf32>
    %cst_20 = arith.constant dense<0xFF800000> : vector<8xf32>
    %26 = vector.multi_reduction <maximumf>, %25, %cst_20 [1] : vector<8x8xf32> to vector<8xf32>
    %27 = vector.shape_cast %26 : vector<8xf32> to vector<8x1xf32>
    %28 = vector.broadcast %27 : vector<8x1xf32> to vector<8x8xf32>
    %29 = arith.subf %25, %28 : vector<8x8xf32>
    %30 = math.exp %29 : vector<8x8xf32>
    %cst_21 = arith.constant dense<0.000000e+00> : vector<8xf32>
    %31 = vector.multi_reduction <add>, %30, %cst_21 [1] : vector<8x8xf32> to vector<8xf32>
    %32 = vector.shape_cast %31 : vector<8xf32> to vector<8x1xf32>
    %cst_22 = arith.constant dense<0.000000e+00> : vector<8x8xf32>
    %33 = tpu.matmul %30, %22, %cst_22 {dimension_numbers = #tpu.dot_dimension_numbers<[1], [0], [0], [1], [0, 0, 1, 1], [], []>} : vector<8x8xf32>, vector<8x8xf32>, vector<8x8xf32> -> vector<8x8xf32>
    %34 = tpu.reciprocal %32 {approx = true} : vector<8x1xf32> -> vector<8x1xf32>
    %35 = vector.broadcast %34 : vector<8x1xf32> to vector<8x8xf32>
    %36 = arith.mulf %33, %35 : vector<8x8xf32>
    %c0_23 = arith.constant 0 : index
    %c0_24 = arith.constant 0 : index
    %37 = vector.load %arg10[%c0_23, %c0_24] : memref<8x32xf32, #tpu.memory_space<vmem>>, vector<8x8xf32>
    tpu.vector_store %arg10[%c0_23, %c0_24], %36 {strides = array<i32>} : memref<8x32xf32, #tpu.memory_space<vmem>>, vector<8x8xf32>,
    %38 = vector.extract_strided_slice %8 {offsets = [0, 8], sizes = [8, 8], strides = [1, 1]} : vector<8x32xf32> to vector<8x8xf32>
    %39 = vector.extract_strided_slice %13 {offsets = [0, 8], sizes = [8, 8], strides = [1, 1]} : vector<8x32xf32> to vector<8x8xf32>
    %40 = vector.extract_strided_slice %18 {offsets = [0, 8], sizes = [8, 8], strides = [1, 1]} : vector<8x32xf32> to vector<8x8xf32>
    %cst_25 = arith.constant dense<0.000000e+00> : vector<8x8xf32>
    %41 = tpu.matmul %38, %39, %cst_25 {dimension_numbers = #tpu.dot_dimension_numbers<[1], [1], [0], [0], [0, 0, 1, 0], [], []>} : vector<8x8xf32>, vector<8x8xf32>, vector<8x8xf32> -> vector<8x8xf32>
    %42 = vector.broadcast %19 : vector<1x8xf32> to vector<8x8xf32>
    %43 = arith.addf %41, %42 : vector<8x8xf32>
    %cst_26 = arith.constant dense<0xFF800000> : vector<8xf32>
    %44 = vector.multi_reduction <maximumf>, %43, %cst_26 [1] : vector<8x8xf32> to vector<8xf32>
    %45 = vector.shape_cast %44 : vector<8xf32> to vector<8x1xf32>
    %46 = vector.broadcast %45 : vector<8x1xf32> to vector<8x8xf32>
    %47 = arith.subf %43, %46 : vector<8x8xf32>
    %48 = math.exp %47 : vector<8x8xf32>
    %cst_27 = arith.constant dense<0.000000e+00> : vector<8xf32>
    %49 = vector.multi_reduction <add>, %48, %cst_27 [1] : vector<8x8xf32> to vector<8xf32>
    %50 = vector.shape_cast %49 : vector<8xf32> to vector<8x1xf32>
    %cst_28 = arith.constant dense<0.000000e+00> : vector<8x8xf32>
    %51 = tpu.matmul %48, %40, %cst_28 {dimension_numbers = #tpu.dot_dimension_numbers<[1], [0], [0], [1], [0, 0, 1, 1], [], []>} : vector<8x8xf32>, vector<8x8xf32>, vector<8x8xf32> -> vector<8x8xf32>
    %52 = tpu.reciprocal %50 {approx = true} : vector<8x1xf32> -> vector<8x1xf32>
    %53 = vector.broadcast %52 : vector<8x1xf32> to vector<8x8xf32>
    %54 = arith.mulf %51, %53 : vector<8x8xf32>
    %c0_29 = arith.constant 0 : index
    %c8 = arith.constant 8 : index
    %55 = vector.load %arg10[%c0_29, %c8] : memref<8x32xf32, #tpu.memory_space<vmem>>, vector<8x8xf32>
    tpu.vector_store %arg10[%c0_29, %c8], %54 {strides = array<i32>} : memref<8x32xf32, #tpu.memory_space<vmem>>, vector<8x8xf32>,
    %56 = vector.extract_strided_slice %8 {offsets = [0, 16], sizes = [8, 8], strides = [1, 1]} : vector<8x32xf32> to vector<8x8xf32>
    %57 = vector.extract_strided_slice %13 {offsets = [0, 16], sizes = [8, 8], strides = [1, 1]} : vector<8x32xf32> to vector<8x8xf32>
    %58 = vector.extract_strided_slice %18 {offsets = [0, 16], sizes = [8, 8], strides = [1, 1]} : vector<8x32xf32> to vector<8x8xf32>
    %cst_30 = arith.constant dense<0.000000e+00> : vector<8x8xf32>
    %59 = tpu.matmul %56, %57, %cst_30 {dimension_numbers = #tpu.dot_dimension_numbers<[1], [1], [0], [0], [0, 0, 1, 0], [], []>} : vector<8x8xf32>, vector<8x8xf32>, vector<8x8xf32> -> vector<8x8xf32>
    %60 = vector.broadcast %19 : vector<1x8xf32> to vector<8x8xf32>
    %61 = arith.addf %59, %60 : vector<8x8xf32>
    %cst_31 = arith.constant dense<0xFF800000> : vector<8xf32>
    %62 = vector.multi_reduction <maximumf>, %61, %cst_31 [1] : vector<8x8xf32> to vector<8xf32>
    %63 = vector.shape_cast %62 : vector<8xf32> to vector<8x1xf32>
    %64 = vector.broadcast %63 : vector<8x1xf32> to vector<8x8xf32>
    %65 = arith.subf %61, %64 : vector<8x8xf32>
    %66 = math.exp %65 : vector<8x8xf32>
    %cst_32 = arith.constant dense<0.000000e+00> : vector<8xf32>
    %67 = vector.multi_reduction <add>, %66, %cst_32 [1] : vector<8x8xf32> to vector<8xf32>
    %68 = vector.shape_cast %67 : vector<8xf32> to vector<8x1xf32>
    %cst_33 = arith.constant dense<0.000000e+00> : vector<8x8xf32>
    %69 = tpu.matmul %66, %58, %cst_33 {dimension_numbers = #tpu.dot_dimension_numbers<[1], [0], [0], [1], [0, 0, 1, 1], [], []>} : vector<8x8xf32>, vector<8x8xf32>, vector<8x8xf32> -> vector<8x8xf32>
    %70 = tpu.reciprocal %68 {approx = true} : vector<8x1xf32> -> vector<8x1xf32>
    %71 = vector.broadcast %70 : vector<8x1xf32> to vector<8x8xf32>
    %72 = arith.mulf %69, %71 : vector<8x8xf32>
    %c0_34 = arith.constant 0 : index
    %c16 = arith.constant 16 : index
    %73 = vector.load %arg10[%c0_34, %c16] : memref<8x32xf32, #tpu.memory_space<vmem>>, vector<8x8xf32>
    tpu.vector_store %arg10[%c0_34, %c16], %72 {strides = array<i32>} : memref<8x32xf32, #tpu.memory_space<vmem>>, vector<8x8xf32>,
    %74 = vector.extract_strided_slice %8 {offsets = [0, 24], sizes = [8, 8], strides = [1, 1]} : vector<8x32xf32> to vector<8x8xf32>
    %75 = vector.extract_strided_slice %13 {offsets = [0, 24], sizes = [8, 8], strides = [1, 1]} : vector<8x32xf32> to vector<8x8xf32>
    %76 = vector.extract_strided_slice %18 {offsets = [0, 24], sizes = [8, 8], strides = [1, 1]} : vector<8x32xf32> to vector<8x8xf32>
    %cst_35 = arith.constant dense<0.000000e+00> : vector<8x8xf32>
    %77 = tpu.matmul %74, %75, %cst_35 {dimension_numbers = #tpu.dot_dimension_numbers<[1], [1], [0], [0], [0, 0, 1, 0], [], []>} : vector<8x8xf32>, vector<8x8xf32>, vector<8x8xf32> -> vector<8x8xf32>
    %78 = vector.broadcast %19 : vector<1x8xf32> to vector<8x8xf32>
    %79 = arith.addf %77, %78 : vector<8x8xf32>
    %cst_36 = arith.constant dense<0xFF800000> : vector<8xf32>
    %80 = vector.multi_reduction <maximumf>, %79, %cst_36 [1] : vector<8x8xf32> to vector<8xf32>
    %81 = vector.shape_cast %80 : vector<8xf32> to vector<8x1xf32>
    %82 = vector.broadcast %81 : vector<8x1xf32> to vector<8x8xf32>
    %83 = arith.subf %79, %82 : vector<8x8xf32>
    %84 = math.exp %83 : vector<8x8xf32>
    %cst_37 = arith.constant dense<0.000000e+00> : vector<8xf32>
    %85 = vector.multi_reduction <add>, %84, %cst_37 [1] : vector<8x8xf32> to vector<8xf32>
    %86 = vector.shape_cast %85 : vector<8xf32> to vector<8x1xf32>
    %cst_38 = arith.constant dense<0.000000e+00> : vector<8x8xf32>
    %87 = tpu.matmul %84, %76, %cst_38 {dimension_numbers = #tpu.dot_dimension_numbers<[1], [0], [0], [1], [0, 0, 1, 1], [], []>} : vector<8x8xf32>, vector<8x8xf32>, vector<8x8xf32> -> vector<8x8xf32>
    %88 = tpu.reciprocal %86 {approx = true} : vector<8x1xf32> -> vector<8x1xf32>
    %89 = vector.broadcast %88 : vector<8x1xf32> to vector<8x8xf32>
    %90 = arith.mulf %87, %89 : vector<8x8xf32>
    %c0_39 = arith.constant 0 : index
    %c24 = arith.constant 24 : index
    %91 = vector.load %arg10[%c0_39, %c24] : memref<8x32xf32, #tpu.memory_space<vmem>>, vector<8x8xf32>
    tpu.vector_store %arg10[%c0_39, %c24], %90 {strides = array<i32>} : memref<8x32xf32, #tpu.memory_space<vmem>>, vector<8x8xf32>,
    %c0_40 = arith.constant 0 : index
    %c0_41 = arith.constant 0 : index
    %92 = vector.load %arg10[%c0_40, %c0_41] : memref<8x32xf32, #tpu.memory_space<vmem>>, vector<8x32xf32>
    %c0_42 = arith.constant 0 : index
    %c0_43 = arith.constant 0 : index
    %93 = vector.load %arg9[%c0_42, %c0_43] : memref<8x32xf32, #tpu.memory_space<vmem>>, vector<8x32xf32>
    tpu.vector_store %arg9[%c0_42, %c0_43], %92 {strides = array<i32>} : memref<8x32xf32, #tpu.memory_space<vmem>>, vector<8x32xf32>,
    return
  }
  func.func @transform_0(%arg0: i32) -> (i32, i32) {
    %c0_i32 = arith.constant 0 : i32
    %c0_i32_0 = arith.constant 0 : i32
    return %arg0, %c0_i32 : i32, i32
  }
  func.func @transform_1(%arg0: i32) -> (i32, i32, i32) {
    %c0_i32 = arith.constant 0 : i32
    %c0_i32_0 = arith.constant 0 : i32
    %c0_i32_1 = arith.constant 0 : i32
    return %arg0, %c0_i32, %c0_i32_0 : i32, i32, i32
  }
  func.func @transform_2(%arg0: i32) -> (i32, i32) {
    %c0_i32 = arith.constant 0 : i32
    %c0_i32_0 = arith.constant 0 : i32
    %c0_i32_1 = arith.constant 0 : i32
    return %c0_i32, %c0_i32_0 : i32, i32
  }
  func.func @transform_3(%arg0: i32) -> (i32, i32) {
    %c0_i32 = arith.constant 0 : i32
    %c0_i32_0 = arith.constant 0 : i32
    %c0_i32_1 = arith.constant 0 : i32
    return %c0_i32, %c0_i32_0 : i32, i32
  }
  func.func @transform_4(%arg0: i32) -> (i32, i32) {
    %c0_i32 = arith.constant 0 : i32
    %c0_i32_0 = arith.constant 0 : i32
    %c0_i32_1 = arith.constant 0 : i32
    return %c0_i32, %c0_i32_0 : i32, i32
  }
  func.func @transform_5(%arg0: i32) -> (i32, i32) {
    %c0_i32 = arith.constant 0 : i32
    %c0_i32_0 = arith.constant 0 : i32
    %c0_i32_1 = arith.constant 0 : i32
    return %c0_i32, %c0_i32_0 : i32, i32
  }
  func.func @transform_6(%arg0: i32) -> (i32, i32) {
    %c0_i32 = arith.constant 0 : i32
    %c0_i32_0 = arith.constant 0 : i32
    %c0_i32_1 = arith.constant 0 : i32
    return %c0_i32, %c0_i32_0 : i32, i32
  }
  func.func @transform_7(%arg0: i32) -> (i32, i32) {
    %c0_i32 = arith.constant 0 : i32
    %c0_i32_0 = arith.constant 0 : i32
    %c0_i32_1 = arith.constant 0 : i32
    return %c0_i32, %c0_i32_0 : i32, i32
  }
  func.func @transform_8(%arg0: i32) -> (i32, i32) {
    %c0_i32 = arith.constant 0 : i32
    %c0_i32_0 = arith.constant 0 : i32
    return %arg0, %c0_i32 : i32, i32
  }
}

module attributes {stable_mosaic.version = 11 : i64} {
  func.func @_self_attention_kernel(%arg0: i32, %arg1: memref<8x32xf32, #tpu.memory_space<vmem>>, %arg2: memref<1x1x8xf32, #tpu.memory_space<vmem>>, %arg3: memref<32x32xf32, #tpu.memory_space<vmem>>, %arg4: memref<32x32xf32, #tpu.memory_space<vmem>>, %arg5: memref<32x32xf32, #tpu.memory_space<vmem>>, %arg6: memref<1x32xf32, #tpu.memory_space<vmem>>, %arg7: memref<1x32xf32, #tpu.memory_space<vmem>>, %arg8: memref<1x32xf32, #tpu.memory_space<vmem>>, %arg9: memref<8x32xf32, #tpu.memory_space<vmem>>, %arg10: memref<8x32xf32, #tpu.memory_space<vmem>>) attributes {dimension_semantics = [#tpu.dimension_semantics<parallel>], iteration_bounds = array<i64: 2>, scalar_prefetch = 0 : i64, scratch_operands = 1 : i64, tpu.core_type = #tpu.core_type<tc>, window_params = [{transform_indices = @transform_0, window_bounds = array<i64: 8, 32>}, {transform_indices = @transform_1, window_bounds = array<i64: 1, 1, 8>}, {pipeline_mode = #tpu.pipeline_mode<synchronous>, transform_indices = @transform_2, window_bounds = array<i64: 32, 32>}, {pipeline_mode = #tpu.pipeline_mode<synchronous>, transform_indices = @transform_3, window_bounds = array<i64: 32, 32>}, {pipeline_mode = #tpu.pipeline_mode<synchronous>, transform_indices = @transform_4, window_bounds = array<i64: 32, 32>}, {pipeline_mode = #tpu.pipeline_mode<synchronous>, transform_indices = @transform_5, window_bounds = array<i64: 1, 32>}, {pipeline_mode = #tpu.pipeline_mode<synchronous>, transform_indices = @transform_6, window_bounds = array<i64: 1, 32>}, {pipeline_mode = #tpu.pipeline_mode<synchronous>, transform_indices = @transform_7, window_bounds = array<i64: 1, 32>}, {transform_indices = @transform_8, window_bounds = array<i64: 8, 32>}]} {
    %c0 = arith.constant 0 : index
    %c0_0 = arith.constant 0 : index
    %0 = vector.load %arg1[%c0, %c0_0] : memref<8x32xf32, #tpu.memory_space<vmem>>, vector<8x32xf32>
    %c0_1 = arith.constant 0 : index
    %c0_2 = arith.constant 0 : index
    %c0_3 = arith.constant 0 : index
    %1 = vector.load %arg2[%c0_1, %c0_2, %c0_3] : memref<1x1x8xf32, #tpu.memory_space<vmem>>, vector<1x1x8xf32>
    %c0_4 = arith.constant 0 : index
    %c0_5 = arith.constant 0 : index
    %2 = vector.load %arg3[%c0_4, %c0_5] : memref<32x32xf32, #tpu.memory_space<vmem>>, vector<32x32xf32>
    %cst = arith.constant dense<0.000000e+00> : vector<8x32xf32>
    %3 = tpu.matmul %0, %2, %cst {dimension_numbers = #tpu.dot_dimension_numbers<[1], [0], [0], [1], [0, 0, 1, 1], [], []>} : vector<8x32xf32>, vector<32x32xf32>, vector<8x32xf32> -> vector<8x32xf32>
    %c0_6 = arith.constant 0 : index
    %c0_7 = arith.constant 0 : index
    %4 = vector.load %arg6[%c0_6, %c0_7] : memref<1x32xf32, #tpu.memory_space<vmem>>, vector<1x32xf32>
    %5 = vector.broadcast %4 : vector<1x32xf32> to vector<8x32xf32>
    %6 = arith.addf %3, %5 : vector<8x32xf32>
    %cst_8 = arith.constant 0.353553385 : f32
    %7 = vector.broadcast %cst_8 : f32 to vector<8x32xf32>
    %8 = arith.mulf %6, %7 : vector<8x32xf32>
    %c0_9 = arith.constant 0 : index
    %c0_10 = arith.constant 0 : index
    %9 = vector.load %arg4[%c0_9, %c0_10] : memref<32x32xf32, #tpu.memory_space<vmem>>, vector<32x32xf32>
    %cst_11 = arith.constant dense<0.000000e+00> : vector<8x32xf32>
    %10 = tpu.matmul %0, %9, %cst_11 {dimension_numbers = #tpu.dot_dimension_numbers<[1], [0], [0], [1], [0, 0, 1, 1], [], []>} : vector<8x32xf32>, vector<32x32xf32>, vector<8x32xf32> -> vector<8x32xf32>
    %c0_12 = arith.constant 0 : index
    %c0_13 = arith.constant 0 : index
    %11 = vector.load %arg7[%c0_12, %c0_13] : memref<1x32xf32, #tpu.memory_space<vmem>>, vector<1x32xf32>
    %12 = vector.broadcast %11 : vector<1x32xf32> to vector<8x32xf32>
    %13 = arith.addf %10, %12 : vector<8x32xf32>
    %c0_14 = arith.constant 0 : index
    %c0_15 = arith.constant 0 : index
    %14 = vector.load %arg5[%c0_14, %c0_15] : memref<32x32xf32, #tpu.memory_space<vmem>>, vector<32x32xf32>
    %cst_16 = arith.constant dense<0.000000e+00> : vector<8x32xf32>
    %15 = tpu.matmul %0, %14, %cst_16 {dimension_numbers = #tpu.dot_dimension_numbers<[1], [0], [0], [1], [0, 0, 1, 1], [], []>} : vector<8x32xf32>, vector<32x32xf32>, vector<8x32xf32> -> vector<8x32xf32>
    %c0_17 = arith.constant 0 : index
    %c0_18 = arith.constant 0 : index
    %16 = vector.load %arg8[%c0_17, %c0_18] : memref<1x32xf32, #tpu.memory_space<vmem>>, vector<1x32xf32>
    %17 = vector.broadcast %16 : vector<1x32xf32> to vector<8x32xf32>
    %18 = arith.addf %15, %17 : vector<8x32xf32>
    %19 = vector.shape_cast %1 : vector<1x1x8xf32> to vector<1x8xf32>
    %20 = vector.extract_strided_slice %8 {offsets = [0, 0], sizes = [8, 8], strides = [1, 1]} : vector<8x32xf32> to vector<8x8xf32>
    %21 = vector.extract_strided_slice %13 {offsets = [0, 0], sizes = [8, 8], strides = [1, 1]} : vector<8x32xf32> to vector<8x8xf32>
    %22 = vector.extract_strided_slice %18 {offsets = [0, 0], sizes = [8, 8], strides = [1, 1]} : vector<8x32xf32> to vector<8x8xf32>
    %cst_19 = arith.constant dense<0.000000e+00> : vector<8x8xf32>
    %23 = tpu.matmul %20, %21, %cst_19 {dimension_numbers = #tpu.dot_dimension_numbers<[1], [1], [0], [0], [0, 0, 1, 0], [], []>} : vector<8x8xf32>, vector<8x8xf32>, vector<8x8xf32> -> vector<8x8xf32>
    %24 = vector.broadcast %19 : vector<1x8xf32> to vector<8x8xf32>
    %25 = arith.addf %23, %24 : vector<8x8xf32>
    %cst_20 = arith.constant dense<0xFF800000> : vector<8xf32>
    %26 = vector.multi_reduction <maximumf>, %25, %cst_20 [1] : vector<8x8xf32> to vector<8xf32>
    %27 = vector.shape_cast %26 : vector<8xf32> to vector<8x1xf32>
    %28 = vector.broadcast %27 : vector<8x1xf32> to vector<8x8xf32>
    %29 = arith.subf %25, %28 : vector<8x8xf32>
    %30 = math.exp %29 : vector<8x8xf32>
    %cst_21 = arith.constant dense<0.000000e+00> : vector<8xf32>
    %31 = vector.multi_reduction <add>, %30, %cst_21 [1] : vector<8x8xf32> to vector<8xf32>
    %32 = vector.shape_cast %31 : vector<8xf32> to vector<8x1xf32>
    %cst_22 = arith.constant dense<0.000000e+00> : vector<8x8xf32>
    %33 = tpu.matmul %30, %22, %cst_22 {dimension_numbers = #tpu.dot_dimension_numbers<[1], [0], [0], [1], [0, 0, 1, 1], [], []>} : vector<8x8xf32>, vector<8x8xf32>, vector<8x8xf32> -> vector<8x8xf32>
    %34 = tpu.reciprocal %32 {approx = true} : vector<8x1xf32> -> vector<8x1xf32>
    %35 = vector.broadcast %34 : vector<8x1xf32> to vector<8x8xf32>
    %36 = arith.mulf %33, %35 : vector<8x8xf32>
    %c0_23 = arith.constant 0 : index
    %c0_24 = arith.constant 0 : index
    %37 = vector.load %arg10[%c0_23, %c0_24] : memref<8x32xf32, #tpu.memory_space<vmem>>, vector<8x8xf32>
    tpu.vector_store %arg10[%c0_23, %c0_24], %36 {strides = array<i32>} : memref<8x32xf32, #tpu.memory_space<vmem>>, vector<8x8xf32>,
    %38 = vector.extract_strided_slice %8 {offsets = [0, 8], sizes = [8, 8], strides = [1, 1]} : vector<8x32xf32> to vector<8x8xf32>
    %39 = vector.extract_strided_slice %13 {offsets = [0, 8], sizes = [8, 8], strides = [1, 1]} : vector<8x32xf32> to vector<8x8xf32>
    %40 = vector.extract_strided_slice %18 {offsets = [0, 8], sizes = [8, 8], strides = [1, 1]} : vector<8x32xf32> to vector<8x8xf32>
    %cst_25 = arith.constant dense<0.000000e+00> : vector<8x8xf32>
    %41 = tpu.matmul %38, %39, %cst_25 {dimension_numbers = #tpu.dot_dimension_numbers<[1], [1], [0], [0], [0, 0, 1, 0], [], []>} : vector<8x8xf32>, vector<8x8xf32>, vector<8x8xf32> -> vector<8x8xf32>
    %42 = vector.broadcast %19 : vector<1x8xf32> to vector<8x8xf32>
    %43 = arith.addf %41, %42 : vector<8x8xf32>
    %cst_26 = arith.constant dense<0xFF800000> : vector<8xf32>
    %44 = vector.multi_reduction <maximumf>, %43, %cst_26 [1] : vector<8x8xf32> to vector<8xf32>
    %45 = vector.shape_cast %44 : vector<8xf32> to vector<8x1xf32>
    %46 = vector.broadcast %45 : vector<8x1xf32> to vector<8x8xf32>
    %47 = arith.subf %43, %46 : vector<8x8xf32>
    %48 = math.exp %47 : vector<8x8xf32>
    %cst_27 = arith.constant dense<0.000000e+00> : vector<8xf32>
    %49 = vector.multi_reduction <add>, %48, %cst_27 [1] : vector<8x8xf32> to vector<8xf32>
    %50 = vector.shape_cast %49 : vector<8xf32> to vector<8x1xf32>
    %cst_28 = arith.constant dense<0.000000e+00> : vector<8x8xf32>
    %51 = tpu.matmul %48, %40, %cst_28 {dimension_numbers = #tpu.dot_dimension_numbers<[1], [0], [0], [1], [0, 0, 1, 1], [], []>} : vector<8x8xf32>, vector<8x8xf32>, vector<8x8xf32> -> vector<8x8xf32>
    %52 = tpu.reciprocal %50 {approx = true} : vector<8x1xf32> -> vector<8x1xf32>
    %53 = vector.broadcast %52 : vector<8x1xf32> to vector<8x8xf32>
    %54 = arith.mulf %51, %53 : vector<8x8xf32>
    %c0_29 = arith.constant 0 : index
    %c8 = arith.constant 8 : index
    %55 = vector.load %arg10[%c0_29, %c8] : memref<8x32xf32, #tpu.memory_space<vmem>>, vector<8x8xf32>
    tpu.vector_store %arg10[%c0_29, %c8], %54 {strides = array<i32>} : memref<8x32xf32, #tpu.memory_space<vmem>>, vector<8x8xf32>,
    %56 = vector.extract_strided_slice %8 {offsets = [0, 16], sizes = [8, 8], strides = [1, 1]} : vector<8x32xf32> to vector<8x8xf32>
    %57 = vector.extract_strided_slice %13 {offsets = [0, 16], sizes = [8, 8], strides = [1, 1]} : vector<8x32xf32> to vector<8x8xf32>
    %58 = vector.extract_strided_slice %18 {offsets = [0, 16], sizes = [8, 8], strides = [1, 1]} : vector<8x32xf32> to vector<8x8xf32>
    %cst_30 = arith.constant dense<0.000000e+00> : vector<8x8xf32>
    %59 = tpu.matmul %56, %57, %cst_30 {dimension_numbers = #tpu.dot_dimension_numbers<[1], [1], [0], [0], [0, 0, 1, 0], [], []>} : vector<8x8xf32>, vector<8x8xf32>, vector<8x8xf32> -> vector<8x8xf32>
    %60 = vector.broadcast %19 : vector<1x8xf32> to vector<8x8xf32>
    %61 = arith.addf %59, %60 : vector<8x8xf32>
    %cst_31 = arith.constant dense<0xFF800000> : vector<8xf32>
    %62 = vector.multi_reduction <maximumf>, %61, %cst_31 [1] : vector<8x8xf32> to vector<8xf32>
    %63 = vector.shape_cast %62 : vector<8xf32> to vector<8x1xf32>
    %64 = vector.broadcast %63 : vector<8x1xf32> to vector<8x8xf32>
    %65 = arith.subf %61, %64 : vector<8x8xf32>
    %66 = math.exp %65 : vector<8x8xf32>
    %cst_32 = arith.constant dense<0.000000e+00> : vector<8xf32>
    %67 = vector.multi_reduction <add>, %66, %cst_32 [1] : vector<8x8xf32> to vector<8xf32>
    %68 = vector.shape_cast %67 : vector<8xf32> to vector<8x1xf32>
    %cst_33 = arith.constant dense<0.000000e+00> : vector<8x8xf32>
    %69 = tpu.matmul %66, %58, %cst_33 {dimension_numbers = #tpu.dot_dimension_numbers<[1], [0], [0], [1], [0, 0, 1, 1], [], []>} : vector<8x8xf32>, vector<8x8xf32>, vector<8x8xf32> -> vector<8x8xf32>
    %70 = tpu.reciprocal %68 {approx = true} : vector<8x1xf32> -> vector<8x1xf32>
    %71 = vector.broadcast %70 : vector<8x1xf32> to vector<8x8xf32>
    %72 = arith.mulf %69, %71 : vector<8x8xf32>
    %c0_34 = arith.constant 0 : index
    %c16 = arith.constant 16 : index
    %73 = vector.load %arg10[%c0_34, %c16] : memref<8x32xf32, #tpu.memory_space<vmem>>, vector<8x8xf32>
    tpu.vector_store %arg10[%c0_34, %c16], %72 {strides = array<i32>} : memref<8x32xf32, #tpu.memory_space<vmem>>, vector<8x8xf32>,
    %74 = vector.extract_strided_slice %8 {offsets = [0, 24], sizes = [8, 8], strides = [1, 1]} : vector<8x32xf32> to vector<8x8xf32>
    %75 = vector.extract_strided_slice %13 {offsets = [0, 24], sizes = [8, 8], strides = [1, 1]} : vector<8x32xf32> to vector<8x8xf32>
    %76 = vector.extract_strided_slice %18 {offsets = [0, 24], sizes = [8, 8], strides = [1, 1]} : vector<8x32xf32> to vector<8x8xf32>
    %cst_35 = arith.constant dense<0.000000e+00> : vector<8x8xf32>
    %77 = tpu.matmul %74, %75, %cst_35 {dimension_numbers = #tpu.dot_dimension_numbers<[1], [1], [0], [0], [0, 0, 1, 0], [], []>} : vector<8x8xf32>, vector<8x8xf32>, vector<8x8xf32> -> vector<8x8xf32>
    %78 = vector.broadcast %19 : vector<1x8xf32> to vector<8x8xf32>
    %79 = arith.addf %77, %78 : vector<8x8xf32>
    %cst_36 = arith.constant dense<0xFF800000> : vector<8xf32>
    %80 = vector.multi_reduction <maximumf>, %79, %cst_36 [1] : vector<8x8xf32> to vector<8xf32>
    %81 = vector.shape_cast %80 : vector<8xf32> to vector<8x1xf32>
    %82 = vector.broadcast %81 : vector<8x1xf32> to vector<8x8xf32>
    %83 = arith.subf %79, %82 : vector<8x8xf32>
    %84 = math.exp %83 : vector<8x8xf32>
    %cst_37 = arith.constant dense<0.000000e+00> : vector<8xf32>
    %85 = vector.multi_reduction <add>, %84, %cst_37 [1] : vector<8x8xf32> to vector<8xf32>
    %86 = vector.shape_cast %85 : vector<8xf32> to vector<8x1xf32>
    %cst_38 = arith.constant dense<0.000000e+00> : vector<8x8xf32>
    %87 = tpu.matmul %84, %76, %cst_38 {dimension_numbers = #tpu.dot_dimension_numbers<[1], [0], [0], [1], [0, 0, 1, 1], [], []>} : vector<8x8xf32>, vector<8x8xf32>, vector<8x8xf32> -> vector<8x8xf32>
    %88 = tpu.reciprocal %86 {approx = true} : vector<8x1xf32> -> vector<8x1xf32>
    %89 = vector.broadcast %88 : vector<8x1xf32> to vector<8x8xf32>
    %90 = arith.mulf %87, %89 : vector<8x8xf32>
    %c0_39 = arith.constant 0 : index
    %c24 = arith.constant 24 : index
    %91 = vector.load %arg10[%c0_39, %c24] : memref<8x32xf32, #tpu.memory_space<vmem>>, vector<8x8xf32>
    tpu.vector_store %arg10[%c0_39, %c24], %90 {strides = array<i32>} : memref<8x32xf32, #tpu.memory_space<vmem>>, vector<8x8xf32>,
    %c0_40 = arith.constant 0 : index
    %c0_41 = arith.constant 0 : index
    %92 = vector.load %arg10[%c0_40, %c0_41] : memref<8x32xf32, #tpu.memory_space<vmem>>, vector<8x32xf32>
    %c0_42 = arith.constant 0 : index
    %c0_43 = arith.constant 0 : index
    %93 = vector.load %arg9[%c0_42, %c0_43] : memref<8x32xf32, #tpu.memory_space<vmem>>, vector<8x32xf32>
    tpu.vector_store %arg9[%c0_42, %c0_43], %92 {strides = array<i32>} : memref<8x32xf32, #tpu.memory_space<vmem>>, vector<8x32xf32>,
    return
  }
  func.func @transform_0(%arg0: i32) -> (i32, i32) {
    %c0_i32 = arith.constant 0 : i32
    %c0_i32_0 = arith.constant 0 : i32
    return %arg0, %c0_i32 : i32, i32
  }
  func.func @transform_1(%arg0: i32) -> (i32, i32, i32) {
    %c0_i32 = arith.constant 0 : i32
    %c0_i32_0 = arith.constant 0 : i32
    %c0_i32_1 = arith.constant 0 : i32
    return %arg0, %c0_i32, %c0_i32_0 : i32, i32, i32
  }
  func.func @transform_2(%arg0: i32) -> (i32, i32) {
    %c0_i32 = arith.constant 0 : i32
    %c0_i32_0 = arith.constant 0 : i32
    %c0_i32_1 = arith.constant 0 : i32
    return %c0_i32, %c0_i32_0 : i32, i32
  }
  func.func @transform_3(%arg0: i32) -> (i32, i32) {
    %c0_i32 = arith.constant 0 : i32
    %c0_i32_0 = arith.constant 0 : i32
    %c0_i32_1 = arith.constant 0 : i32
    return %c0_i32, %c0_i32_0 : i32, i32
  }
  func.func @transform_4(%arg0: i32) -> (i32, i32) {
    %c0_i32 = arith.constant 0 : i32
    %c0_i32_0 = arith.constant 0 : i32
    %c0_i32_1 = arith.constant 0 : i32
    return %c0_i32, %c0_i32_0 : i32, i32
  }
  func.func @transform_5(%arg0: i32) -> (i32, i32) {
    %c0_i32 = arith.constant 0 : i32
    %c0_i32_0 = arith.constant 0 : i32
    %c0_i32_1 = arith.constant 0 : i32
    return %c0_i32, %c0_i32_0 : i32, i32
  }
  func.func @transform_6(%arg0: i32) -> (i32, i32) {
    %c0_i32 = arith.constant 0 : i32
    %c0_i32_0 = arith.constant 0 : i32
    %c0_i32_1 = arith.constant 0 : i32
    return %c0_i32, %c0_i32_0 : i32, i32
  }
  func.func @transform_7(%arg0: i32) -> (i32, i32) {
    %c0_i32 = arith.constant 0 : i32
    %c0_i32_0 = arith.constant 0 : i32
    %c0_i32_1 = arith.constant 0 : i32
    return %c0_i32, %c0_i32_0 : i32, i32
  }
  func.func @transform_8(%arg0: i32) -> (i32, i32) {
    %c0_i32 = arith.constant 0 : i32
    %c0_i32_0 = arith.constant 0 : i32
    return %arg0, %c0_i32 : i32, i32
  }
}

</mosaic_0001>

<bundles_post_ra>
// kernel: tpu_custom_call.1
= control target key start
LH: loop header
LB: loop body
LE: loop exit
PB: predicated region body
PF: predicated region fallthrough
CT: control target
= control target key end

     0   :  { %s2308_s0 = inlined_call_operand.hbm [shape: f32[16,32], index: 0, kind: input, shape index: {}]   ;;  %s2309_s1 = inlined_call_operand.hbm [shape: f32[2,1,8], index: 1, kind: input, shape index: {}]   ;;  %s2310_s2 = inlined_call_operand.hbm [shape: f32[32,32], index: 2, kind: input, shape index: {}]   ;;  %s2311_s3 = inlined_call_operand.hbm [shape: f32[32,32], index: 3, kind: input, shape index: {}]   ;;  %s2312_s4 = inlined_call_operand.hbm [shape: f32[32,32], index: 4, kind: input, shape index: {}]   ;;  %s2313_s5 = inlined_call_operand.vmem [shape: f32[1,32], index: 5, kind: input, shape index: {}]   ;;  %s2314_s6 = inlined_call_operand.vmem [shape: f32[1,32], index: 6, kind: input, shape index: {}]   ;;  %s2315_s7 = inlined_call_operand.vmem [shape: f32[1,32], index: 7, kind: input, shape index: {}]   ;;  %s2316_s8 = inlined_call_operand.hbm [shape: f32[16,32], index: 8, kind: output, shape index: {}]  }
   0x1   :  { %2321 = sst [smem:[#allocation18_spill]] %s2310_s2 }
   0x2   :  { %2322 = sst [smem:[#allocation19_spill]] %s2311_s3 }
   0x3   :  { %2323 = sst [smem:[#allocation20_spill]] %s2312_s4 }
   0x4   :  { %13 = vsyncpa [#allocation4], 0 }
   0x5   :  { %15 = vsyncpa [#allocation4 + $0x1], 0 }
   0x6   :  { %16 = vsyncpa [#allocation7], 0 }
   0x7   :  { %18 = vsyncpa [#allocation7 + $0x1], 0 }
   0x8   :  { %19 = vsyncpa [#allocation10], 0 }
   0x9   :  { %20 = vsyncpa [#allocation5], 0 }
   0xa   :  { %22 = vsyncpa [#allocation5 + $0x1], 0  ;;  %s1987_s27 = smov 0   ;;  %s1989_s28 = smov 0  }
   0xb   :  { %s1991_s29 = smov 0   ;;  %s1993_s30 = smov 0  }
   0xc LB: > { %s2008_s9 = sadd.s32 4294967295, %s1924_s30   ;;  %s1464_s10 = sadd.s32 4294967294, %s1924_s30   ;;  %s1924_s30 = sphi %s1993_s30, %s2347_s30   ;;  %s1920_s29 = sphi %s1991_s29, %s2346_s29   ;;  %s1916_s28 = sphi %s1989_s28, %s2345_s28   ;;  %s1912_s27 = sphi %s1987_s27, %s2344_s27  }
   0xd   : > { %p48_p0 = scmp.ne.s32.totalorder %s1916_s28, %s1912_s27  ;;  %p2317_p1 = scmp.eq.s32.totalorder %s2008_s9, 0 }
   0xe   : > { %p230_p3 = scmp.eq.s32.totalorder %s1464_s10, 1  ;;  %p1465_p5 = scmp.ge.s32.totalorder %s1924_s30, 1 }
   0xf   : > { %p2017_p4 = por %p2317_p1, %p48_p0  ;;  %p237_p7 = scmp.lt.s32.totalorder %s1924_s30, 3 }
  0x10   : > { %p2022_p6 = por %p230_p3, %p48_p0  ;;  %s1926_s14 = smov [#allocation8]  }
  0x11   : > { %s2324_s11 = scalar_select %p2017_p4, 1, 0 }
  0x12   : > { %s2325_s12 = scalar_select %p2022_p6, 1, 0 }
  0x13   : > { %p2027_p8 = pnand %p1465_p5, %p237_p7  ;;  %s249_s15 = sshll.u32 %s1926_s14, 4  ;;  %s250_s15 = int_to_ptr.vmem [resolvable:$true] %s249_s15 }
  0x14   : > { %s1927_s17 = smov [#allocation9]   ;;  %s1928_s19 = smov [#allocation11]  }
  0x15   : > { %s2326_s13 = scalar_select %p2027_p8, 1, 0 }
  0x16   : > { %p1624_p9 = pneg %p2027_p8  ;;  %s262_s18 = sshll.u32 %s1927_s17, 4  ;;  %s263_s18 = int_to_ptr.vmem [resolvable:$true] %s262_s18 }
  0x17   : > { %s275_s20 = sshll.u32 %s1928_s19, 4  ;;  %s1725_s21 = scalar_lea.vmem %s250_s15, 512  ;;  %s276_s20 = int_to_ptr.vmem [resolvable:$true] %s275_s20 }
  0x18   : > { %p2036_p11 = pnand %p1624_p9, %p2317_p1  ;;  %p1726_p13 = scmp.ne.s32.totalorder %s250_s15, %s1725_s21 }
  0x19   : > { %p1733_p5 = scmp.lt.s32.totalorder %s250_s15, %s250_s15  ;;  %p1734_p7 = scmp.lt.s32.totalorder %s1725_s21, %s1725_s21 }
  0x1a   : > { %p1716_p12 = pneg %p2036_p11 }
  0x1b   : > { %p1735_p9 = por %p1734_p7, %p1733_p5 }
  0x1c   : > { %p1728_p0 = pnand %p1726_p13, %p1716_p12 }
  0x1e   : > { %p1729_p3 = pneg %p1728_p0 }
  0x20   : > { %p1736_p10 = pnand %p1735_p9, %p1729_p3 }
  0x22   : > { %1739 = shalt.err (!%p1736_p10)
}
  0x23   : > { %s1929_s22 = smov 128   ;;  %s1930_s23 = smov 8  }
  0x24   : > { %s2328_s2 = sld [smem:[#allocation18_spill]]  ;;  %s1751_s26 = scalar_lea.vmem %s263_s18, 512 }
  0x25   : > { %p1752_p1 = scmp.ne.s32.totalorder %s263_s18, %s1751_s26  ;;  %p1759_p2 = scmp.lt.s32.totalorder %s263_s18, %s263_s18 }
  0x26   : > { %p1760_p6 = scmp.lt.s32.totalorder %s1751_s26, %s1751_s26 }
  0x27   : > { %p1754_p13 = pnand %p1752_p1, %p1716_p12 }
  0x28   : > { %p1761_p5 = por %p1760_p6, %p1759_p2 }
  0x29   : > { %p1755_p0 = pneg %p1754_p13 }
  0x2a   : > { %1627 = dma.hbm_to_vmem [thread:$0]  (!%p2036_p11), %s2328_s2, 512, %s250_s15, [#allocation7], %s1929_s22, %s1929_s22, %s1930_s23  }
  0x2b   : > { %p1762_p3 = pnand %p1761_p5, %p1755_p0 }
  0x2d   : > { %1765 = shalt.err (!%p1762_p3)
}
  0x2e   : > { %s2329_s3 = sld [smem:[#allocation19_spill]]  ;;  %s1777_s15 = scalar_lea.vmem %s276_s20, 512 }
  0x2f   : > { %p1778_p10 = scmp.ne.s32.totalorder %s276_s20, %s1777_s15  ;;  %p1785_p9 = scmp.lt.s32.totalorder %s276_s20, %s276_s20 }
  0x30   : > { %p1786_p13 = scmp.lt.s32.totalorder %s1777_s15, %s1777_s15 }
  0x31   : > { %p1780_p7 = pnand %p1778_p10, %p1716_p12 }
  0x32   : > { %p1787_p4 = por %p1786_p13, %p1785_p9 }
  0x33   : > { %p1781_p1 = pneg %p1780_p7 }
  0x34   : > { %1630 = dma.hbm_to_vmem [thread:$0]  (!%p2036_p11), %s2329_s3, 512, %s263_s18, [#allocation10], %s1929_s22, %s1929_s22, %s1930_s23  }
  0x35   : > { %p1788_p2 = pnand %p1787_p4, %p1781_p1 }
  0x37   : > { %1791 = shalt.err (!%p1788_p2)
}
  0x38   : > { %s2330_s4 = sld [smem:[#allocation20_spill]]  ;;  %s2067_s18 = sadd.s32 1, %s1924_s30  }
  0x39   : > { %s32_s21 = ssub.s32 %s1924_s30, %s2067_s18  ;;  %s35_s16 = sadd.s32 1, %s1920_s29 }
  0x3a   : > { %p33_p4 = scmp.eq.s32.totalorder %s32_s21, 0  ;;  %p42_p6 = scmp.ne.s32.totalorder %s1920_s29, %s1916_s28 }
  0x3b   : > { %p43_p12 = scmp.eq.s32.totalorder %s1924_s30, 0  ;;  %p1648_p0 = scmp.lt.s32.totalorder %s1924_s30, 2 }
  0x3c   : > { %s2077_s24 = scalar_select %p33_p4, %s1920_s29, %s35_s16  }
  0x3d   : > { %p44_p5 = por %p43_p12, %p42_p6  ;;  %p2331_p3 = scmp.eq.s32.totalorder %s2008_s9, 1 }
  0x3e   : > { %1633 = dma.hbm_to_vmem [thread:$0]  (!%p2036_p11), %s2330_s4, 512, %s276_s20, [#allocation10], %s1929_s22, %s1929_s22, %s1930_s23  }
  0x3f   : > { %p2081_p10 = por %p2331_p3, %p42_p6  ;;  %s2086_s26 = sand.u32 1, %s1920_s29  }
  0x40   : > { %s1471_s20 = sshll.u32 %s1924_s30, 7  ;;  %s1470_s22 = sshll.u32 %s2086_s26, 3 }
  0x41   : > { %s2332_s25 = scalar_select %p2081_p10, 1, 0 }
  0x42   : > { %s2093_s14 = scalar_lea.hbm %s2308_s0, %s1471_s20  ;;  %s302_s15 = scalar_lea.vmem [#allocation3], %s1470_s22 }
  0x43   : > { %s309_s17 = sshll.u32 %s302_s15, 4  ;;  %p2095_p11 = pnand %p1648_p0, %p44_p5  ;;  %s310_s17 = int_to_ptr.vmem [resolvable:$true] %s309_s17 }
  0x44   : > { %s299_s16 = scalar_lea.sflag [#allocation4], %s2086_s26  ;;  %s1792_s2 = scalar_lea.hbm %s2093_s14, 128 }
  0x45   : > { %p1793_p7 = scmp.ne.s32.totalorder %s2093_s14, %s1792_s2  ;;  %p1794_p1 = pneg %p2095_p11 }
  0x46   : > { %s1797_s23 = scalar_lea.hbm %s2308_s0, 256  ;;  %p1798_p2 = scmp.lt.s32.totalorder %s2093_s14, %s2308_s0 }
  0x47   : > { %p1795_p9 = pnand %p1794_p1, %p1793_p7  ;;  %p1799_p4 = scmp.lt.s32.totalorder %s1797_s23, %s1792_s2 }
  0x49   : > { %p1796_p13 = pneg %p1795_p9  ;;  %p1800_p6 = por %p1799_p4, %p1798_p2 }
  0x4b   : > { %p1801_p12 = pnand %p1800_p6, %p1796_p13 }
  0x4d   : > { %1804 = shalt.err (!%p1801_p12)
}
  0x4e   : > { %s1805_s21 = scalar_lea.vmem %s310_s17, 128  ;;  %s1931_s3 = smov [#allocation3]  }
  0x4f   : > { %p1806_p0 = scmp.ne.s32.totalorder %s310_s17, %s1805_s21  ;;  %s1810_s4 = sshll.u32 %s1931_s3, 4  ;;  %s1811_s4 = int_to_ptr.vmem [resolvable:$false] %s1810_s4 }
  0x50   : > { %s1812_s20 = scalar_lea.vmem %s1811_s4, 256  ;;  %p1813_p7 = scmp.lt.s32.totalorder %s310_s17, %s1811_s4 }
  0x51   : > { %p1808_p5 = pnand %p1806_p0, %p1794_p1  ;;  %p1814_p9 = scmp.lt.s32.totalorder %s1812_s20, %s1805_s21 }
  0x53   : > { %p1809_p3 = pneg %p1808_p5  ;;  %p1815_p10 = por %p1814_p9, %p1813_p7 }
  0x55   : > { %p1816_p8 = pnand %p1815_p10, %p1809_p3 }
  0x57   : > { %1819 = shalt.err (!%p1816_p8)
}
  0x58   : > { %1637 = dma.hbm_to_vmem [thread:$0]  (!%p2095_p11), %s2093_s14, 128, %s310_s17, %s299_s16  }
  0x59   : > { %s1472_s2 = sshll.u32 %s1924_s30, 4  ;;  %s319_s4 = scalar_lea.vmem [#allocation6], %s2086_s26 }
  0x5a   : > { %s2125_s3 = scalar_lea.hbm %s2309_s1, %s1472_s2  ;;  %s326_s21 = sshll.u32 %s319_s4, 4  ;;  %s327_s21 = int_to_ptr.vmem [resolvable:$true] %s326_s21 }
  0x5b   : > { %s2334_s10 = sand.u32 1, %s1924_s30   ;;  %s1820_s20 = scalar_lea.hbm %s2125_s3, 16 }
  0x5c   : > { %s317_s15 = scalar_lea.sflag [#allocation7], %s2334_s10  ;;  %p1821_p8 = scmp.ne.s32.totalorder %s2125_s3, %s1820_s20 }
  0x5d   : > { %s1825_s16 = scalar_lea.hbm %s2309_s1, 32  ;;  %p1826_p2 = scmp.lt.s32.totalorder %s2125_s3, %s2309_s1 }
  0x5e   : > { %p1823_p10 = pnand %p1821_p8, %p1794_p1  ;;  %p1827_p4 = scmp.lt.s32.totalorder %s1825_s16, %s1820_s20 }
  0x60   : > { %p1824_p13 = pneg %p1823_p10  ;;  %p1828_p6 = por %p1827_p4, %p1826_p2 }
  0x62   : > { %p1829_p12 = pnand %p1828_p6, %p1824_p13 }
  0x64   : > { %1832 = shalt.err (!%p1829_p12)
}
  0x65   : > { %s1833_s26 = scalar_lea.vmem %s327_s21, 16  ;;  %s1932_s23 = smov [#allocation6]  }
  0x66   : > { %p1834_p0 = scmp.ne.s32.totalorder %s327_s21, %s1833_s26  ;;  %s1838_s4 = sshll.u32 %s1932_s23, 4  ;;  %s1839_s4 = int_to_ptr.vmem [resolvable:$false] %s1838_s4 }
  0x67   : > { %s1840_s10 = scalar_lea.vmem %s1839_s4, 32  ;;  %p1841_p7 = scmp.lt.s32.totalorder %s327_s21, %s1839_s4 }
  0x68   : > { %p1836_p5 = pnand %p1834_p0, %p1794_p1  ;;  %p1842_p9 = scmp.lt.s32.totalorder %s1840_s10, %s1833_s26 }
  0x6a   : > { %p1837_p3 = pneg %p1836_p5  ;;  %p1843_p8 = por %p1842_p9, %p1841_p7 }
  0x6c   : > { %p1844_p10 = pnand %p1843_p8, %p1837_p3 }
  0x6e   : > { %1847 = shalt.err (!%p1844_p10)
}
  0x6f   : > { %1640 = dma.hbm_to_vmem [thread:$0]  (!%p2095_p11), %s2125_s3, 16, %s327_s21, %s317_s15  }
  0x70   : > { %p2335_p13 = scmp.ne.s32.totalorder %s2326_s13, 0 }
  0x71   : > { %s2151_s20 = sand.u32 (!%p2335_p13), 1, %s1916_s28   ;;  %p2336_p1 = scmp.ne.s32.totalorder (!%p2335_p13), %s2324_s11, 0 }
  0x72   : > { %335 = sbr.rel (%p2335_p13) target bundleno = 1146 (0x47a), region = 52  ;;  %s1474_s14 = sshll.u32 (!%p2335_p13), %s2151_s20, 3 }
  0x73   : > { %s338_s17 = scalar_lea.sflag (!%p2335_p13), [#allocation4], %s2151_s20  ;;  %s2157_s16 = scalar_lea.vmem (!%p2335_p13), [#allocation3], %s1474_s14 }
  0x77   : > { %1891 = dma.done.wait (%p2336_p1), %s338_s17, 128  }
  0x78   : > { %1893 = vsyncadd (%p2336_p1), %s338_s17, 4294967168  ;;  %s346_s13 = sand.u32 1, %s2008_s9   ;;  %s349_s3 = scalar_lea.vmem [#allocation6], %s2151_s20 }
  0x79   : > { %s347_s19 = scalar_lea.sflag [#allocation7], %s346_s13 }
  0x7a   : > { %1895 = dma.done.wait (%p2336_p1), %s347_s19, 16  }
  0x7b   : > { %1897 = vsyncadd (%p2336_p1), %s347_s19, 4294967280  ;;  %p2337_p11 = scmp.eq.s32.totalorder %s2008_s9, 0 }
  0x7d   : > { %1899 = dma.done.wait (%p2337_p11), [#allocation7], 512   ;;  %p2338_p2 = pmov %p2337_p11 }
  0x7f   : > { %1901 = vsyncadd (%p2338_p2), [#allocation7], 4294966784  ;;  %p2339_p4 = pmov %p2338_p2 }
  0x80   : > { %p2340_p6 = pmov %p2338_p2 }
  0x81   : > { %1903 = dma.done.wait (%p2339_p4), [#allocation10], 1024  }
  0x82   : > { %1905 = vsyncadd (%p2340_p6), [#allocation10], 4294966272  ;;  %v1933_v0 = vmov 0.0   ;;  %vm1934_vm0 = vmmov 0   ;;  %v403_v1 = vld [vmem:[#allocation8 + $0x18] sm:$0xff]  ;;  %v402_v3 = vld [vmem:[#allocation8 + $0x10] sm:$0xff] }
  0x83   : > { %1533 = vmatprep.subr.mxu0 %v1933_v0  ;;  %1544 = vmatprep.subr.mxu1 %v1933_v0  ;;  %v489_v2 = vld [vmem:[#allocation9 + $0x18] sm:$0xff]  ;;  %v488_v4 = vld [vmem:[#allocation9 + $0x10] sm:$0xff]  ;;  %v401_v5 = vld [vmem:[#allocation8 + $0x8] sm:$0xff]  ;;  %vm411_vm1 = vcmask 261120   ;;  %vm654_vm2 = vcmask 64512   ;;  %s1935_s22 = smov 112  }
  0x84   : > { %1541 = vmatprep.mubr.msk.f32.mxu0 %vm1934_vm0, %v1933_v0  ;;  %1552 = vmatprep.mubr.msk.f32.mxu1 %vm1934_vm0, %v1933_v0  ;;  %v487_v6 = vld [vmem:[#allocation9 + $0x8] sm:$0xff]  ;;  %v400_v7 = vld [vmem:[#allocation8] sm:$0xff]  ;;  %v570_v10 = vld [vmem:[#allocation11 + $0x18] sm:$0xff]  ;;  %s1936_s26 = smov 120   ;;  %s1937_s23 = smov 104   ;;  %vm986_vm3 = vcmask 130112  }
  0x85   : > { %1534 = vmatpush3.msra.mxu0 %v403_v1  ;;  %1545 = vmatpush3.msra.mxu1 %v489_v2  ;;  %v486_v8 = vld [vmem:[#allocation9] sm:$0xff]  ;;  %v398_v9 = vld [vmem:[%s2157_s16] sm:$0xff]  ;;  %s1938_s17 = smov 8   ;;  %s1939_s16 = smov 16   ;;  %vm1157_vm4 = vcmask 195712   ;;  %vm1328_vm5 = vcmask 261312  }
  0x86   : > { %1535 = vmatprep.subr.mxu0 %v1933_v0  ;;  %1546 = vmatprep.subr.mxu1 %v1933_v0  ;;  %v569_v11 = vld [vmem:[#allocation11 + $0x10] sm:$0xff]  ;;  %v568_v12 = vld [vmem:[#allocation11 + $0x8] sm:$0xff]  ;;  %v567_v13 = vld [vmem:[#allocation11] sm:$0xff]  ;;  %s1940_s13 = smov 24   ;;  %s1499_s19 = sshll.u32 %s2008_s9, 7 }
  0x87   : > { %1536 = vmatpush3.msra.mxu0 %v402_v3  ;;  %1547 = vmatpush3.msra.mxu1 %v488_v4  ;;  %v1479_v14 = vld [vmem:[%s2313_s5] ss:$0 sm:$0xff]  ;;  %s2270_s2 = scalar_lea.hbm %s2316_s8, %s1499_s19  ;;  %p2341_p0 = scmp.ne.s32.totalorder %s2332_s25, 0 }
  0x88   : > { %1537 = vmatprep.subr.mxu0 %v1933_v0  ;;  %1548 = vmatprep.subr.mxu1 %v1933_v0  ;;  %v1481_v15 = vld [vmem:[%s2314_s6] ss:$0 sm:$0xff] }
  0x89   : > { %1538 = vmatpush3.msra.mxu0 %v401_v5  ;;  %1549 = vmatpush3.msra.mxu1 %v487_v6  ;;  %v1483_v23 = vld [vmem:[%s2315_s7] ss:$0 sm:$0xff] }
  0x8a   : > { %1539 = vmatprep.subr.mxu0 %v1933_v0  ;;  %1550 = vmatprep.subr.mxu1 %v1933_v0  ;;  %v1485_v33 = vld [vmem:[%s349_s3] ss:$0 sm:$0xff]  ;;  %s397_s3 = scalar_lea.vmem [#allocation12], %s1474_s14 }
  0x8b   : > { %1540 = vmatpush3.msra.mxu0 %v400_v7  ;;  %1551 = vmatpush3.msra.mxu1 %v486_v8  ;;  %s1346_s11 = sshll.u32 %s397_s3, 4  ;;  %s1347_s11 = int_to_ptr.vmem [resolvable:$true] %s1346_s11 }
  0x8c   : > { %1542 = vmatmul.mubr.msk.f32.vlgmr.msra.gmra.mxu0 %vm411_vm1, %v398_v9  ;;  %1553 = vmatmul.mubr.msk.f32.vlgmr.msra.gmra.mxu1 %vm411_vm1, %v398_v9 }
  0x8d   : > { %1566 = vmatprep.subr.mxu1 %v1933_v0  ;;  %1568 = vmatprep.mubr.msk.f32.mxu1 %vm1934_vm0, %v1933_v0 }
  0x8e   : > { %1555 = vmatprep.subr.mxu0 %v1933_v0  ;;  %1563 = vmatprep.mubr.msk.f32.mxu0 %vm1934_vm0, %v1933_v0 }
  0x8f   : > { %1556 = vmatpush3.msra.mxu0 %v570_v10 }
  0x90   : > { %1557 = vmatprep.subr.mxu0 %v1933_v0 }
  0x91   : > { %1558 = vmatpush3.msra.mxu0 %v569_v11 }
  0x92   : > { %1559 = vmatprep.subr.mxu0 %v1933_v0 }
  0x93   : > { %1560 = vmatpush3.msra.mxu0 %v568_v12 }
  0x94   : > { %1561 = vmatprep.subr.mxu0 %v1933_v0 }
  0x95   : > { %1562 = vmatpush3.msra.mxu0 %v567_v13 }
  0x96   : > { %1564 = vmatmul.mubr.msk.f32.vlgmr.msra.gmra.mxu0 %vm411_vm1, %v398_v9  ;;  %1576 = vmatprep.subr.mxu0 %v1933_v0 }
  0x97   : > { %1578 = vmatprep.mubr.msk.f32.mxu0 %vm1934_vm0, %v1933_v0 }
 0x14c   : > { %v481_v16 = vpop.f32.mrf.mxu0  ;;  %v563_v17 = vpop.f32.mrf.mxu1 }
 0x14d   : > { %v482_v18 = vadd.f32 %v1479_v14, %v481_v16  ;;  %v564_v19 = vadd.f32 %v1481_v15, %v563_v17 }
 0x14e   : > { %v1543_v20 = vpop.f32.mrf.mxu0  ;;  %v1554_v21 = vpop.f32.mrf.mxu1 }
 0x14f   : > { %v485_v22 = vmul.f32 0.35355338, %v482_v18  ;;  %990 = vrot.lane.b32.xlu1 %v564_v19, %s1935_s22  ;;  %818 = vrot.lane.b32.xlu0 %v564_v19, %s1936_s26 }
 0x150   : > { %1567 = vmatpush3.xpose.msk.msra.mxu1 %vm654_vm2, %v564_v19 }
 0x151   : > { %1571 = vmatprep.subr.mxu1 %v1933_v0 }
 0x153   : > { %1569 = vmatmul.mubr.msk.f32.vlgmr.msra.gmra.mxu1 %vm654_vm2, %v485_v22  ;;  %988 = vrot.lane.b32.xlu1 %v485_v22, %s1935_s22 }
 0x154   : > { %816 = vrot.lane.b32.xlu0 %v485_v22, %s1936_s26  ;;  %1573 = vmatprep.mubr.msk.f32.mxu1 %vm1934_vm0, %v1933_v0 }
 0x156   : > { %v644_v24 = vpop.f32.mrf.mxu0 }
 0x157   : > { %1159 = vrot.lane.b32.xlu1 %v485_v22, %s1937_s23  ;;  %v645_v25 = vadd.f32 %v1483_v23, %v644_v24 }
 0x158   : > { %1161 = vrot.lane.b32.xlu0 %v564_v19, %s1937_s23  ;;  %v1565_v26 = vpop.f32.mrf.mxu0 }
 0x159   : > { %1572 = vmatpush3.msra.mxu1 %v645_v25 }
 0x15a   : > { %1581 = vmatprep.subr.mxu1 %v1933_v0 }
 0x1c1   : > { %v819_v27 = vpop.permute.xlu0 %818  ;;  %v991_v28 = vpop.permute.xlu1 %990 }
 0x1c2   : > { %1577 = vmatpush3.xpose.msk.msra.mxu0 %vm654_vm2, %v819_v27 }
 0x1c3   : > { %1586 = vmatprep.subr.mxu0 %v1933_v0 }
 0x1c5   : > { %v989_v30 = vpop.permute.xlu1 %988 }
 0x1c6   : > { %v817_v29 = vpop.permute.xlu0 %816 }
 0x1c7   : > { %1579 = vmatmul.mubr.msk.f32.vlgmr.msra.gmra.mxu0 %vm654_vm2, %v817_v29 }
 0x1c8   : > { %1587 = vmatpush3.xpose.msk.msra.mxu0 %vm654_vm2, %v991_v28  ;;  %1588 = vmatprep.mubr.msk.f32.mxu0 %vm1934_vm0, %v1933_v0 }
 0x1c9   : > { %1596 = vmatprep.subr.mxu0 %v1933_v0  ;;  %v1160_v32 = vpop.permute.xlu1 %1159 }
 0x1ca   : > { %v1162_v31 = vpop.permute.xlu0 %1161 }
 0x1cb   : > { %1589 = vmatmul.mubr.msk.f32.vlgmr.msra.gmra.mxu0 %vm654_vm2, %v989_v30 }
 0x1cc   : > { %1597 = vmatpush3.xpose.msk.msra.mxu0 %vm654_vm2, %v1162_v31  ;;  %1598 = vmatprep.mubr.msk.f32.mxu0 %vm1934_vm0, %v1933_v0 }
 0x1cf   : > { %1599 = vmatmul.mubr.msk.f32.vlgmr.msra.gmra.mxu0 %vm654_vm2, %v1160_v32 }
 0x213   : > { %v727_v34 = vpop.f32.mrf.mxu1 }
 0x214   : > { %v728_v35 = vadd.f32 %v1485_v33, %v727_v34 }
 0x215   : > { %v1570_v36 = vpop.f32.mrf.mxu1 }
 0x216   : > { %v731_v37 = vsel %vm654_vm2, %v728_v35, -inf }
 0x217   : > { %732 = vmax.xlane.f32.xlu0 %v731_v37 }
 0x287   : > { %v890_v38 = vpop.f32.mrf.mxu0 }
 0x288   : > { %v891_v39 = vadd.f32 %v1485_v33, %v890_v38 }
 0x289   : > { %v1580_v40 = vpop.f32.mrf.mxu0 }
 0x28a   : > { %v894_v41 = vsel %vm654_vm2, %v891_v39, -inf }
 0x28b   : > { %895 = vmax.xlane.f32.xlu1 %v894_v41  ;;  %v1062_v42 = vpop.f32.mrf.mxu0 }
 0x28c   : > { %v1063_v43 = vadd.f32 %v1485_v33, %v1062_v42 }
 0x28d   : > { %v1590_v44 = vpop.f32.mrf.mxu0 }
 0x28e   : > { %v1066_v45 = vsel %vm654_vm2, %v1063_v43, -inf }
 0x28f   : > { %1067 = vmax.xlane.f32.xlu0 %v1066_v45  ;;  %v1233_v46 = vpop.f32.mrf.mxu0 }
 0x290   : > { %v1234_v47 = vadd.f32 %v1485_v33, %v1233_v46 }
 0x291   : > { %v1600_v48 = vpop.f32.mrf.mxu0 }
 0x292   : > { %v1237_v49 = vsel %vm654_vm2, %v1234_v47, -inf }
 0x293   : > { %1238 = vmax.xlane.f32.xlu0 %v1237_v49 }
 0x29c   : > { %904 = vrot.lane.b32.xlu1 %v645_v25, %s1936_s26  ;;  %s1848_s26 = scalar_lea.vmem %s1347_s11, 128 }
 0x29d   : > { %p1849_p12 = scmp.ne.s32.totalorder %s1347_s11, %s1848_s26 }
 0x29f   : > { %p1850_p5 = pnand %p1849_p12, %p2341_p0 }
 0x2a0   : > { %v733_v50 = vpop.xlane.xlu0 %732  ;;  %1246 = vrot.lane.b32.xlu1 %v645_v25, %s1937_s23  ;;  %s1941_s23 = smov [#allocation12]  }
 0x2a1   : > { %v734_v51 = vsub.f32 %v728_v35, %v733_v50  ;;  %p1851_p3 = pneg %p1850_p5  ;;  %s1852_s9 = sshll.u32 %s1941_s23, 4  ;;  %s1853_s9 = int_to_ptr.vmem [resolvable:$false] %s1852_s9 }
 0x2a2   : > { %s1854_s14 = scalar_lea.vmem %s1853_s9, 256  ;;  %p1855_p7 = scmp.lt.s32.totalorder %s1347_s11, %s1853_s9 }
 0x2a3   : > { %v735_v52 = vmul.f32 1.442695, %v734_v51  ;;  %p1856_p9 = scmp.lt.s32.totalorder %s1854_s14, %s1848_s26 }
 0x2a5   : > { %1698 = vpow2.f32 %v735_v52  ;;  %p1857_p8 = por %p1856_p9, %p1855_p7 }
 0x2a7   : > { %p1858_p10 = pnand %p1857_p8, %p1851_p3 }
 0x2a9   : > { %1075 = vrot.lane.b32.xlu0 %v645_v25, %s1935_s22  ;;  %s1333_s22 = scalar_lea.sflag [#allocation5], %s2151_s20 }
 0x2b2   : > { %v1699_v53 = vpop.eup %1698 }
 0x2b3   : > { %1574 = vmatmul.mubr.msk.f32.vlgmr.msra.gmra.mxu1 %vm654_vm2, %v1699_v53  ;;  %v737_v6 = vsel %vm654_vm2, %v1699_v53, 0.0 }
 0x2b4   : > { %1583 = vmatprep.mubr.msk.f32.mxu1 %vm1934_vm0, %v1933_v0 }
 0x314   : > { %v896_v54 = vpop.xlane.xlu1 %895 }
 0x315   : > { %v897_v55 = vsub.f32 %v891_v39, %v896_v54 }
 0x317   : > { %v898_v56 = vmul.f32 1.442695, %v897_v55 }
 0x318   : > { %v905_v57 = vpop.permute.xlu1 %904  ;;  %v1068_v58 = vpop.xlane.xlu0 %1067 }
 0x319   : > { %1700 = vpow2.f32 %v898_v56  ;;  %v1069_v59 = vsub.f32 %v1063_v43, %v1068_v58  ;;  %1582 = vmatpush3.msra.mxu1 %v905_v57 }
 0x31a   : > { %1591 = vmatprep.subr.mxu1 %v1933_v0 }
 0x31b   : > { %v1070_v60 = vmul.f32 1.442695, %v1069_v59 }
 0x31c   : > { %v1239_v61 = vpop.xlane.xlu0 %1238  ;;  %v1247_v5 = vpop.permute.xlu1 %1246 }
 0x31d   : > { %1702 = vpow2.f32 %v1070_v60  ;;  %v1240_v62 = vsub.f32 %v1234_v47, %v1239_v61 }
 0x31f   : > { %v1241_v63 = vmul.f32 1.442695, %v1240_v62 }
 0x320   : > { %v1076_v2 = vpop.permute.xlu0 %1075 }
 0x321   : > { %1704 = vpow2.f32 %v1241_v63 }
 0x326   : > { %v1701_v1 = vpop.eup %1700 }
 0x327   : > { %1584 = vmatmul.mubr.msk.f32.vlgmr.msra.gmra.mxu1 %vm654_vm2, %v1701_v1  ;;  %v900_v3 = vsel %vm654_vm2, %v1701_v1, 0.0 }
 0x328   : > { %1592 = vmatpush3.msra.mxu1 %v1076_v2  ;;  %901 = vadd.xlane.f32.xlu1 %v900_v3 }
 0x329   : > { %1593 = vmatprep.mubr.msk.f32.mxu1 %vm1934_vm0, %v1933_v0  ;;  %1601 = vmatprep.subr.mxu1 %v1933_v0 }
 0x32a   : > { %v1703_v4 = vpop.eup %1702 }
 0x32b   : > { %1594 = vmatmul.mubr.msk.f32.vlgmr.msra.gmra.mxu1 %vm654_vm2, %v1703_v4  ;;  %v1072_v7 = vsel %vm654_vm2, %v1703_v4, 0.0 }
 0x32c   : > { %1602 = vmatpush3.msra.mxu1 %v1247_v5  ;;  %738 = vadd.xlane.f32.xlu1 %v737_v6 }
 0x32d   : > { %1073 = vadd.xlane.f32.xlu0 %v1072_v7  ;;  %1603 = vmatprep.mubr.msk.f32.mxu1 %vm1934_vm0, %v1933_v0 }
 0x32e   : > { %v1705_v8 = vpop.eup %1704 }
 0x32f   : > { %1604 = vmatmul.mubr.msk.f32.vlgmr.msra.gmra.mxu1 %vm654_vm2, %v1705_v8  ;;  %v1243_v9 = vsel %vm654_vm2, %v1705_v8, 0.0 }
 0x331   : > { %1244 = vadd.xlane.f32.xlu0 %v1243_v9 }
 0x373   : > { %v809_v10 = vpop.f32.mrf.mxu1 }
 0x375   : > { %v1575_v11 = vpop.f32.mrf.mxu1 }
 0x3b1   : > { %v902_v12 = vpop.xlane.xlu1 %901 }
 0x3b5   : > { %v739_v13 = vpop.xlane.xlu1 %738 }
 0x3b6   : > { %1706 = vrcp.f32 %v739_v13  ;;  %v1074_v16 = vpop.xlane.xlu0 %1073 }
 0x3b7   : > { %1708 = vrcp.f32 %v902_v12 }
 0x3b8   : > { %1710 = vrcp.f32 %v1074_v16 }
 0x3ba   : > { %v1245_v17 = vpop.xlane.xlu0 %1244 }
 0x3bb   : > { %1712 = vrcp.f32 %v1245_v17 }
 0x3c3   : > { %v1707_v14 = vpop.eup %1706 }
 0x3c4   : > { %v814_v15 = vmul.f32 %v1707_v14, %v809_v10  ;;  %v1709_v0 = vpop.eup %1708 }
 0x3c5   : > { %v1711_v21 = vpop.eup %1710 }
 0x3c6   : > { %815 = vst.msk [vmem:[#allocation2] sm:$0xff] %vm654_vm2, %v814_v15 }
 0x3c8   : > { %v1713_v25 = vpop.eup %1712 }
 0x3e7   : > { %v976_v18 = vpop.f32.mrf.mxu1 }
 0x3e8   : > { %v981_v19 = vmul.f32 %v1709_v0, %v976_v18 }
 0x3e9   : > { %v1585_v20 = vpop.f32.mrf.mxu1 }
 0x3ea   : > { %983 = vrot.lane.b32.xlu0 %v981_v19, %s1938_s17 }
 0x3eb   : > { %v1147_v22 = vpop.f32.mrf.mxu1 }
 0x3ec   : > { %v1152_v23 = vmul.f32 %v1711_v21, %v1147_v22 }
 0x3ed   : > { %v1595_v24 = vpop.f32.mrf.mxu1 }
 0x3ee   : > { %1154 = vrot.lane.b32.xlu1 %v1152_v23, %s1939_s16 }
 0x3ef   : > { %v1318_v26 = vpop.f32.mrf.mxu1 }
 0x3f0   : > { %v1323_v27 = vmul.f32 %v1713_v25, %v1318_v26 }
 0x3f1   : > { %v1605_v28 = vpop.f32.mrf.mxu1 }
 0x3f2   : > { %1325 = vrot.lane.b32.xlu1 %v1323_v27, %s1940_s13 }
 0x45c   : > { %v984_v29 = vpop.permute.xlu0 %983 }
 0x45d   : > { %987 = vst.msk [vmem:[#allocation2] sm:$0xff] %vm986_vm3, %v984_v29 }
 0x460   : > { %v1155_v30 = vpop.permute.xlu1 %1154 }
 0x461   : > { %1158 = vst.msk [vmem:[#allocation2] sm:$0xff] %vm1157_vm4, %v1155_v30 }
 0x464   : > { %v1326_v31 = vpop.permute.xlu1 %1325 }
 0x465   : > { %1329 = vst.msk [vmem:[#allocation2] sm:$0xff] %vm1328_vm5, %v1326_v31 }
 0x46c   : > { %v1330_v32 = vld [vmem:[#allocation2] sm:$0xff] }
 0x46d   : > { %1331 = vst.msk [vmem:[%s397_s3] sm:$0xff] %vm411_vm1, %v1330_v32 }
 0x46e   : > { %1861 = shalt.err (!%p1858_p10)
}
 0x46f   : > { %s1862_s4 = scalar_lea.hbm %s2270_s2, 128  ;;  %s1866_s17 = scalar_lea.hbm %s2316_s8, 256 }
 0x470   : > { %p1863_p13 = scmp.ne.s32.totalorder %s2270_s2, %s1862_s4  ;;  %p1867_p2 = scmp.lt.s32.totalorder %s2270_s2, %s2316_s8 }
 0x471   : > { %p1868_p4 = scmp.lt.s32.totalorder %s1866_s17, %s1862_s4 }
 0x472   : > { %p1864_p1 = pnand %p1863_p13, %p2341_p0 }
 0x473   : > { %p1869_p6 = por %p1868_p4, %p1867_p2 }
 0x474   : > { %p1865_p11 = pneg %p1864_p1 }
 0x476   : > { %p1870_p12 = pnand %p1869_p6, %p1865_p11 }
 0x478   : > { %1873 = shalt.err (!%p1870_p12)
}
 0x479   : > { %1622 = dma.vmem_to_hbm [thread:$0]  (%p2341_p0), %s1347_s11, 128, %s2270_s2, %s1333_s22  }
 0x47a PF: > { %s1358_s19 = sand.u32 1, %s1912_s27   ;;  %p2342_p5 = scmp.ne.s32.totalorder %s2325_s12, 0 }
 0x47b   : > { %p2343_p3 = scmp.ge.s32.totalorder %s1924_s30, 2  ;;  %s1359_s3 = scalar_lea.sflag [#allocation5], %s1358_s19 }
 0x47d   : > { %p1642_p7 = pnand %p2343_p3, %p2342_p5 }
 0x47f   : > { %p1643_p9 = pneg %p1642_p7 }
 0x481   : > { %1907 = dma.done.wait (%p1643_p9), %s1359_s3, 128  }
 0x482   : > { %1909 = vsyncadd (%p1643_p9), %s1359_s3, 4294967168  ;;  %p25_p8 = scmp.ge.s32.totalorder %s2067_s18, 4   ;;  %s2344_s27 = smov %s1916_s28 }
 0x483   : > { %s2345_s28 = smov %s1920_s29  ;;  %s2346_s29 = smov %s2077_s24 }
 0x484   : > { %s2347_s30 = smov %s2067_s18  ;;  %27 = sbr.rel (!%p25_p8) target bundleno = 12 (0xc), region = 122 }
 0x489   :  { %1364 = vsyncpa [#allocation4], 1 }
 0x48a   :  { %1366 = vsyncpa [#allocation4 + $0x1], 1 }
 0x48b   :  { %1367 = vsyncpa [#allocation7], 1 }
 0x48c   :  { %1369 = vsyncpa [#allocation7 + $0x1], 1 }
 0x48d   :  { %1370 = vsyncpa [#allocation10], 1 }
 0x48e   :  { %1371 = vsyncpa [#allocation5], 1 }
 0x48f   :  { %1373 = vsyncpa [#allocation5 + $0x1], 1 }

// kernel: tpu_custom_call.1
= control target key start
LH: loop header
LB: loop body
LE: loop exit
PB: predicated region body
PF: predicated region fallthrough
CT: control target
= control target key end

     0   :  { %s2308_s0 = inlined_call_operand.hbm [shape: f32[16,32], index: 0, kind: input, shape index: {}]   ;;  %s2309_s1 = inlined_call_operand.hbm [shape: f32[2,1,8], index: 1, kind: input, shape index: {}]   ;;  %s2310_s2 = inlined_call_operand.hbm [shape: f32[32,32], index: 2, kind: input, shape index: {}]   ;;  %s2311_s3 = inlined_call_operand.hbm [shape: f32[32,32], index: 3, kind: input, shape index: {}]   ;;  %s2312_s4 = inlined_call_operand.hbm [shape: f32[32,32], index: 4, kind: input, shape index: {}]   ;;  %s2313_s5 = inlined_call_operand.vmem [shape: f32[1,32], index: 5, kind: input, shape index: {}]   ;;  %s2314_s6 = inlined_call_operand.vmem [shape: f32[1,32], index: 6, kind: input, shape index: {}]   ;;  %s2315_s7 = inlined_call_operand.vmem [shape: f32[1,32], index: 7, kind: input, shape index: {}]   ;;  %s2316_s8 = inlined_call_operand.hbm [shape: f32[16,32], index: 8, kind: output, shape index: {}]  }
   0x1   :  { %2321 = sst [smem:[#allocation18_spill]] %s2310_s2 }
   0x2   :  { %2322 = sst [smem:[#allocation19_spill]] %s2311_s3 }
   0x3   :  { %2323 = sst [smem:[#allocation20_spill]] %s2312_s4 }
   0x4   :  { %13 = vsyncpa [#allocation4], 0 }
   0x5   :  { %15 = vsyncpa [#allocation4 + $0x1], 0 }
   0x6   :  { %16 = vsyncpa [#allocation7], 0 }
   0x7   :  { %18 = vsyncpa [#allocation7 + $0x1], 0 }
   0x8   :  { %19 = vsyncpa [#allocation10], 0 }
   0x9   :  { %20 = vsyncpa [#allocation5], 0 }
   0xa   :  { %22 = vsyncpa [#allocation5 + $0x1], 0  ;;  %s1987_s27 = smov 0   ;;  %s1989_s28 = smov 0  }
   0xb   :  { %s1991_s29 = smov 0   ;;  %s1993_s30 = smov 0  }
   0xc LB: > { %s2008_s9 = sadd.s32 4294967295, %s1924_s30   ;;  %s1464_s10 = sadd.s32 4294967294, %s1924_s30   ;;  %s1924_s30 = sphi %s1993_s30, %s2347_s30   ;;  %s1920_s29 = sphi %s1991_s29, %s2346_s29   ;;  %s1916_s28 = sphi %s1989_s28, %s2345_s28   ;;  %s1912_s27 = sphi %s1987_s27, %s2344_s27  }
   0xd   : > { %p48_p0 = scmp.ne.s32.totalorder %s1916_s28, %s1912_s27  ;;  %p2317_p1 = scmp.eq.s32.totalorder %s2008_s9, 0 }
   0xe   : > { %p230_p3 = scmp.eq.s32.totalorder %s1464_s10, 1  ;;  %p1465_p5 = scmp.ge.s32.totalorder %s1924_s30, 1 }
   0xf   : > { %p2017_p4 = por %p2317_p1, %p48_p0  ;;  %p237_p7 = scmp.lt.s32.totalorder %s1924_s30, 3 }
  0x10   : > { %p2022_p6 = por %p230_p3, %p48_p0  ;;  %s1926_s14 = smov [#allocation8]  }
  0x11   : > { %s2324_s11 = scalar_select %p2017_p4, 1, 0 }
  0x12   : > { %s2325_s12 = scalar_select %p2022_p6, 1, 0 }
  0x13   : > { %p2027_p8 = pnand %p1465_p5, %p237_p7  ;;  %s249_s15 = sshll.u32 %s1926_s14, 4  ;;  %s250_s15 = int_to_ptr.vmem [resolvable:$true] %s249_s15 }
  0x14   : > { %s1927_s17 = smov [#allocation9]   ;;  %s1928_s19 = smov [#allocation11]  }
  0x15   : > { %s2326_s13 = scalar_select %p2027_p8, 1, 0 }
  0x16   : > { %p1624_p9 = pneg %p2027_p8  ;;  %s262_s18 = sshll.u32 %s1927_s17, 4  ;;  %s263_s18 = int_to_ptr.vmem [resolvable:$true] %s262_s18 }
  0x17   : > { %s275_s20 = sshll.u32 %s1928_s19, 4  ;;  %s1725_s21 = scalar_lea.vmem %s250_s15, 512  ;;  %s276_s20 = int_to_ptr.vmem [resolvable:$true] %s275_s20 }
  0x18   : > { %p2036_p11 = pnand %p1624_p9, %p2317_p1  ;;  %p1726_p13 = scmp.ne.s32.totalorder %s250_s15, %s1725_s21 }
  0x19   : > { %p1733_p5 = scmp.lt.s32.totalorder %s250_s15, %s250_s15  ;;  %p1734_p7 = scmp.lt.s32.totalorder %s1725_s21, %s1725_s21 }
  0x1a   : > { %p1716_p12 = pneg %p2036_p11 }
  0x1b   : > { %p1735_p9 = por %p1734_p7, %p1733_p5 }
  0x1c   : > { %p1728_p0 = pnand %p1726_p13, %p1716_p12 }
  0x1e   : > { %p1729_p3 = pneg %p1728_p0 }
  0x20   : > { %p1736_p10 = pnand %p1735_p9, %p1729_p3 }
  0x22   : > { %1739 = shalt.err (!%p1736_p10)
}
  0x23   : > { %s1929_s22 = smov 128   ;;  %s1930_s23 = smov 8  }
  0x24   : > { %s2328_s2 = sld [smem:[#allocation18_spill]]  ;;  %s1751_s26 = scalar_lea.vmem %s263_s18, 512 }
  0x25   : > { %p1752_p1 = scmp.ne.s32.totalorder %s263_s18, %s1751_s26  ;;  %p1759_p2 = scmp.lt.s32.totalorder %s263_s18, %s263_s18 }
  0x26   : > { %p1760_p6 = scmp.lt.s32.totalorder %s1751_s26, %s1751_s26 }
  0x27   : > { %p1754_p13 = pnand %p1752_p1, %p1716_p12 }
  0x28   : > { %p1761_p5 = por %p1760_p6, %p1759_p2 }
  0x29   : > { %p1755_p0 = pneg %p1754_p13 }
  0x2a   : > { %1627 = dma.hbm_to_vmem [thread:$0]  (!%p2036_p11), %s2328_s2, 512, %s250_s15, [#allocation7], %s1929_s22, %s1929_s22, %s1930_s23  }
  0x2b   : > { %p1762_p3 = pnand %p1761_p5, %p1755_p0 }
  0x2d   : > { %1765 = shalt.err (!%p1762_p3)
}
  0x2e   : > { %s2329_s3 = sld [smem:[#allocation19_spill]]  ;;  %s1777_s15 = scalar_lea.vmem %s276_s20, 512 }
  0x2f   : > { %p1778_p10 = scmp.ne.s32.totalorder %s276_s20, %s1777_s15  ;;  %p1785_p9 = scmp.lt.s32.totalorder %s276_s20, %s276_s20 }
  0x30   : > { %p1786_p13 = scmp.lt.s32.totalorder %s1777_s15, %s1777_s15 }
  0x31   : > { %p1780_p7 = pnand %p1778_p10, %p1716_p12 }
  0x32   : > { %p1787_p4 = por %p1786_p13, %p1785_p9 }
  0x33   : > { %p1781_p1 = pneg %p1780_p7 }
  0x34   : > { %1630 = dma.hbm_to_vmem [thread:$0]  (!%p2036_p11), %s2329_s3, 512, %s263_s18, [#allocation10], %s1929_s22, %s1929_s22, %s1930_s23  }
  0x35   : > { %p1788_p2 = pnand %p1787_p4, %p1781_p1 }
  0x37   : > { %1791 = shalt.err (!%p1788_p2)
}
  0x38   : > { %s2330_s4 = sld [smem:[#allocation20_spill]]  ;;  %s2067_s18 = sadd.s32 1, %s1924_s30  }
  0x39   : > { %s32_s21 = ssub.s32 %s1924_s30, %s2067_s18  ;;  %s35_s16 = sadd.s32 1, %s1920_s29 }
  0x3a   : > { %p33_p4 = scmp.eq.s32.totalorder %s32_s21, 0  ;;  %p42_p6 = scmp.ne.s32.totalorder %s1920_s29, %s1916_s28 }
  0x3b   : > { %p43_p12 = scmp.eq.s32.totalorder %s1924_s30, 0  ;;  %p1648_p0 = scmp.lt.s32.totalorder %s1924_s30, 2 }
  0x3c   : > { %s2077_s24 = scalar_select %p33_p4, %s1920_s29, %s35_s16  }
  0x3d   : > { %p44_p5 = por %p43_p12, %p42_p6  ;;  %p2331_p3 = scmp.eq.s32.totalorder %s2008_s9, 1 }
  0x3e   : > { %1633 = dma.hbm_to_vmem [thread:$0]  (!%p2036_p11), %s2330_s4, 512, %s276_s20, [#allocation10], %s1929_s22, %s1929_s22, %s1930_s23  }
  0x3f   : > { %p2081_p10 = por %p2331_p3, %p42_p6  ;;  %s2086_s26 = sand.u32 1, %s1920_s29  }
  0x40   : > { %s1471_s20 = sshll.u32 %s1924_s30, 7  ;;  %s1470_s22 = sshll.u32 %s2086_s26, 3 }
  0x41   : > { %s2332_s25 = scalar_select %p2081_p10, 1, 0 }
  0x42   : > { %s2093_s14 = scalar_lea.hbm %s2308_s0, %s1471_s20  ;;  %s302_s15 = scalar_lea.vmem [#allocation3], %s1470_s22 }
  0x43   : > { %s309_s17 = sshll.u32 %s302_s15, 4  ;;  %p2095_p11 = pnand %p1648_p0, %p44_p5  ;;  %s310_s17 = int_to_ptr.vmem [resolvable:$true] %s309_s17 }
  0x44   : > { %s299_s16 = scalar_lea.sflag [#allocation4], %s2086_s26  ;;  %s1792_s2 = scalar_lea.hbm %s2093_s14, 128 }
  0x45   : > { %p1793_p7 = scmp.ne.s32.totalorder %s2093_s14, %s1792_s2  ;;  %p1794_p1 = pneg %p2095_p11 }
  0x46   : > { %s1797_s23 = scalar_lea.hbm %s2308_s0, 256  ;;  %p1798_p2 = scmp.lt.s32.totalorder %s2093_s14, %s2308_s0 }
  0x47   : > { %p1795_p9 = pnand %p1794_p1, %p1793_p7  ;;  %p1799_p4 = scmp.lt.s32.totalorder %s1797_s23, %s1792_s2 }
  0x49   : > { %p1796_p13 = pneg %p1795_p9  ;;  %p1800_p6 = por %p1799_p4, %p1798_p2 }
  0x4b   : > { %p1801_p12 = pnand %p1800_p6, %p1796_p13 }
  0x4d   : > { %1804 = shalt.err (!%p1801_p12)
}
  0x4e   : > { %s1805_s21 = scalar_lea.vmem %s310_s17, 128  ;;  %s1931_s3 = smov [#allocation3]  }
  0x4f   : > { %p1806_p0 = scmp.ne.s32.totalorder %s310_s17, %s1805_s21  ;;  %s1810_s4 = sshll.u32 %s1931_s3, 4  ;;  %s1811_s4 = int_to_ptr.vmem [resolvable:$false] %s1810_s4 }
  0x50   : > { %s1812_s20 = scalar_lea.vmem %s1811_s4, 256  ;;  %p1813_p7 = scmp.lt.s32.totalorder %s310_s17, %s1811_s4 }
  0x51   : > { %p1808_p5 = pnand %p1806_p0, %p1794_p1  ;;  %p1814_p9 = scmp.lt.s32.totalorder %s1812_s20, %s1805_s21 }
  0x53   : > { %p1809_p3 = pneg %p1808_p5  ;;  %p1815_p10 = por %p1814_p9, %p1813_p7 }
  0x55   : > { %p1816_p8 = pnand %p1815_p10, %p1809_p3 }
  0x57   : > { %1819 = shalt.err (!%p1816_p8)
}
  0x58   : > { %1637 = dma.hbm_to_vmem [thread:$0]  (!%p2095_p11), %s2093_s14, 128, %s310_s17, %s299_s16  }
  0x59   : > { %s1472_s2 = sshll.u32 %s1924_s30, 4  ;;  %s319_s4 = scalar_lea.vmem [#allocation6], %s2086_s26 }
  0x5a   : > { %s2125_s3 = scalar_lea.hbm %s2309_s1, %s1472_s2  ;;  %s326_s21 = sshll.u32 %s319_s4, 4  ;;  %s327_s21 = int_to_ptr.vmem [resolvable:$true] %s326_s21 }
  0x5b   : > { %s2334_s10 = sand.u32 1, %s1924_s30   ;;  %s1820_s20 = scalar_lea.hbm %s2125_s3, 16 }
  0x5c   : > { %s317_s15 = scalar_lea.sflag [#allocation7], %s2334_s10  ;;  %p1821_p8 = scmp.ne.s32.totalorder %s2125_s3, %s1820_s20 }
  0x5d   : > { %s1825_s16 = scalar_lea.hbm %s2309_s1, 32  ;;  %p1826_p2 = scmp.lt.s32.totalorder %s2125_s3, %s2309_s1 }
  0x5e   : > { %p1823_p10 = pnand %p1821_p8, %p1794_p1  ;;  %p1827_p4 = scmp.lt.s32.totalorder %s1825_s16, %s1820_s20 }
  0x60   : > { %p1824_p13 = pneg %p1823_p10  ;;  %p1828_p6 = por %p1827_p4, %p1826_p2 }
  0x62   : > { %p1829_p12 = pnand %p1828_p6, %p1824_p13 }
  0x64   : > { %1832 = shalt.err (!%p1829_p12)
}
  0x65   : > { %s1833_s26 = scalar_lea.vmem %s327_s21, 16  ;;  %s1932_s23 = smov [#allocation6]  }
  0x66   : > { %p1834_p0 = scmp.ne.s32.totalorder %s327_s21, %s1833_s26  ;;  %s1838_s4 = sshll.u32 %s1932_s23, 4  ;;  %s1839_s4 = int_to_ptr.vmem [resolvable:$false] %s1838_s4 }
  0x67   : > { %s1840_s10 = scalar_lea.vmem %s1839_s4, 32  ;;  %p1841_p7 = scmp.lt.s32.totalorder %s327_s21, %s1839_s4 }
  0x68   : > { %p1836_p5 = pnand %p1834_p0, %p1794_p1  ;;  %p1842_p9 = scmp.lt.s32.totalorder %s1840_s10, %s1833_s26 }
  0x6a   : > { %p1837_p3 = pneg %p1836_p5  ;;  %p1843_p8 = por %p1842_p9, %p1841_p7 }
  0x6c   : > { %p1844_p10 = pnand %p1843_p8, %p1837_p3 }
  0x6e   : > { %1847 = shalt.err (!%p1844_p10)
}
  0x6f   : > { %1640 = dma.hbm_to_vmem [thread:$0]  (!%p2095_p11), %s2125_s3, 16, %s327_s21, %s317_s15  }
  0x70   : > { %p2335_p13 = scmp.ne.s32.totalorder %s2326_s13, 0 }
  0x71   : > { %s2151_s20 = sand.u32 (!%p2335_p13), 1, %s1916_s28   ;;  %p2336_p1 = scmp.ne.s32.totalorder (!%p2335_p13), %s2324_s11, 0 }
  0x72   : > { %335 = sbr.rel (%p2335_p13) target bundleno = 1146 (0x47a), region = 52  ;;  %s1474_s14 = sshll.u32 (!%p2335_p13), %s2151_s20, 3 }
  0x73   : > { %s338_s17 = scalar_lea.sflag (!%p2335_p13), [#allocation4], %s2151_s20  ;;  %s2157_s16 = scalar_lea.vmem (!%p2335_p13), [#allocation3], %s1474_s14 }
  0x77   : > { %1891 = dma.done.wait (%p2336_p1), %s338_s17, 128  }
  0x78   : > { %1893 = vsyncadd (%p2336_p1), %s338_s17, 4294967168  ;;  %s346_s13 = sand.u32 1, %s2008_s9   ;;  %s349_s3 = scalar_lea.vmem [#allocation6], %s2151_s20 }
  0x79   : > { %s347_s19 = scalar_lea.sflag [#allocation7], %s346_s13 }
  0x7a   : > { %1895 = dma.done.wait (%p2336_p1), %s347_s19, 16  }
  0x7b   : > { %1897 = vsyncadd (%p2336_p1), %s347_s19, 4294967280  ;;  %p2337_p11 = scmp.eq.s32.totalorder %s2008_s9, 0 }
  0x7d   : > { %1899 = dma.done.wait (%p2337_p11), [#allocation7], 512   ;;  %p2338_p2 = pmov %p2337_p11 }
  0x7f   : > { %1901 = vsyncadd (%p2338_p2), [#allocation7], 4294966784  ;;  %p2339_p4 = pmov %p2338_p2 }
  0x80   : > { %p2340_p6 = pmov %p2338_p2 }
  0x81   : > { %1903 = dma.done.wait (%p2339_p4), [#allocation10], 1024  }
  0x82   : > { %1905 = vsyncadd (%p2340_p6), [#allocation10], 4294966272  ;;  %v1933_v0 = vmov 0.0   ;;  %vm1934_vm0 = vmmov 0   ;;  %v403_v1 = vld [vmem:[#allocation8 + $0x18] sm:$0xff]  ;;  %v402_v3 = vld [vmem:[#allocation8 + $0x10] sm:$0xff] }
  0x83   : > { %1533 = vmatprep.subr.mxu0 %v1933_v0  ;;  %1544 = vmatprep.subr.mxu1 %v1933_v0  ;;  %v489_v2 = vld [vmem:[#allocation9 + $0x18] sm:$0xff]  ;;  %v488_v4 = vld [vmem:[#allocation9 + $0x10] sm:$0xff]  ;;  %v401_v5 = vld [vmem:[#allocation8 + $0x8] sm:$0xff]  ;;  %vm411_vm1 = vcmask 261120   ;;  %vm654_vm2 = vcmask 64512   ;;  %s1935_s22 = smov 112  }
  0x84   : > { %1541 = vmatprep.mubr.msk.f32.mxu0 %vm1934_vm0, %v1933_v0  ;;  %1552 = vmatprep.mubr.msk.f32.mxu1 %vm1934_vm0, %v1933_v0  ;;  %v487_v6 = vld [vmem:[#allocation9 + $0x8] sm:$0xff]  ;;  %v400_v7 = vld [vmem:[#allocation8] sm:$0xff]  ;;  %v570_v10 = vld [vmem:[#allocation11 + $0x18] sm:$0xff]  ;;  %s1936_s26 = smov 120   ;;  %s1937_s23 = smov 104   ;;  %vm986_vm3 = vcmask 130112  }
  0x85   : > { %1534 = vmatpush3.msra.mxu0 %v403_v1  ;;  %1545 = vmatpush3.msra.mxu1 %v489_v2  ;;  %v486_v8 = vld [vmem:[#allocation9] sm:$0xff]  ;;  %v398_v9 = vld [vmem:[%s2157_s16] sm:$0xff]  ;;  %s1938_s17 = smov 8   ;;  %s1939_s16 = smov 16   ;;  %vm1157_vm4 = vcmask 195712   ;;  %vm1328_vm5 = vcmask 261312  }
  0x86   : > { %1535 = vmatprep.subr.mxu0 %v1933_v0  ;;  %1546 = vmatprep.subr.mxu1 %v1933_v0  ;;  %v569_v11 = vld [vmem:[#allocation11 + $0x10] sm:$0xff]  ;;  %v568_v12 = vld [vmem:[#allocation11 + $0x8] sm:$0xff]  ;;  %v567_v13 = vld [vmem:[#allocation11] sm:$0xff]  ;;  %s1940_s13 = smov 24   ;;  %s1499_s19 = sshll.u32 %s2008_s9, 7 }
  0x87   : > { %1536 = vmatpush3.msra.mxu0 %v402_v3  ;;  %1547 = vmatpush3.msra.mxu1 %v488_v4  ;;  %v1479_v14 = vld [vmem:[%s2313_s5] ss:$0 sm:$0xff]  ;;  %s2270_s2 = scalar_lea.hbm %s2316_s8, %s1499_s19  ;;  %p2341_p0 = scmp.ne.s32.totalorder %s2332_s25, 0 }
  0x88   : > { %1537 = vmatprep.subr.mxu0 %v1933_v0  ;;  %1548 = vmatprep.subr.mxu1 %v1933_v0  ;;  %v1481_v15 = vld [vmem:[%s2314_s6] ss:$0 sm:$0xff] }
  0x89   : > { %1538 = vmatpush3.msra.mxu0 %v401_v5  ;;  %1549 = vmatpush3.msra.mxu1 %v487_v6  ;;  %v1483_v23 = vld [vmem:[%s2315_s7] ss:$0 sm:$0xff] }
  0x8a   : > { %1539 = vmatprep.subr.mxu0 %v1933_v0  ;;  %1550 = vmatprep.subr.mxu1 %v1933_v0  ;;  %v1485_v33 = vld [vmem:[%s349_s3] ss:$0 sm:$0xff]  ;;  %s397_s3 = scalar_lea.vmem [#allocation12], %s1474_s14 }
  0x8b   : > { %1540 = vmatpush3.msra.mxu0 %v400_v7  ;;  %1551 = vmatpush3.msra.mxu1 %v486_v8  ;;  %s1346_s11 = sshll.u32 %s397_s3, 4  ;;  %s1347_s11 = int_to_ptr.vmem [resolvable:$true] %s1346_s11 }
  0x8c   : > { %1542 = vmatmul.mubr.msk.f32.vlgmr.msra.gmra.mxu0 %vm411_vm1, %v398_v9  ;;  %1553 = vmatmul.mubr.msk.f32.vlgmr.msra.gmra.mxu1 %vm411_vm1, %v398_v9 }
  0x8d   : > { %1566 = vmatprep.subr.mxu1 %v1933_v0  ;;  %1568 = vmatprep.mubr.msk.f32.mxu1 %vm1934_vm0, %v1933_v0 }
  0x8e   : > { %1555 = vmatprep.subr.mxu0 %v1933_v0  ;;  %1563 = vmatprep.mubr.msk.f32.mxu0 %vm1934_vm0, %v1933_v0 }
  0x8f   : > { %1556 = vmatpush3.msra.mxu0 %v570_v10 }
  0x90   : > { %1557 = vmatprep.subr.mxu0 %v1933_v0 }
  0x91   : > { %1558 = vmatpush3.msra.mxu0 %v569_v11 }
  0x92   : > { %1559 = vmatprep.subr.mxu0 %v1933_v0 }
  0x93   : > { %1560 = vmatpush3.msra.mxu0 %v568_v12 }
  0x94   : > { %1561 = vmatprep.subr.mxu0 %v1933_v0 }
  0x95   : > { %1562 = vmatpush3.msra.mxu0 %v567_v13 }
  0x96   : > { %1564 = vmatmul.mubr.msk.f32.vlgmr.msra.gmra.mxu0 %vm411_vm1, %v398_v9  ;;  %1576 = vmatprep.subr.mxu0 %v1933_v0 }
  0x97   : > { %1578 = vmatprep.mubr.msk.f32.mxu0 %vm1934_vm0, %v1933_v0 }
 0x14c   : > { %v481_v16 = vpop.f32.mrf.mxu0  ;;  %v563_v17 = vpop.f32.mrf.mxu1 }
 0x14d   : > { %v482_v18 = vadd.f32 %v1479_v14, %v481_v16  ;;  %v564_v19 = vadd.f32 %v1481_v15, %v563_v17 }
 0x14e   : > { %v1543_v20 = vpop.f32.mrf.mxu0  ;;  %v1554_v21 = vpop.f32.mrf.mxu1 }
 0x14f   : > { %v485_v22 = vmul.f32 0.35355338, %v482_v18  ;;  %990 = vrot.lane.b32.xlu1 %v564_v19, %s1935_s22  ;;  %818 = vrot.lane.b32.xlu0 %v564_v19, %s1936_s26 }
 0x150   : > { %1567 = vmatpush3.xpose.msk.msra.mxu1 %vm654_vm2, %v564_v19 }
 0x151   : > { %1571 = vmatprep.subr.mxu1 %v1933_v0 }
 0x153   : > { %1569 = vmatmul.mubr.msk.f32.vlgmr.msra.gmra.mxu1 %vm654_vm2, %v485_v22  ;;  %988 = vrot.lane.b32.xlu1 %v485_v22, %s1935_s22 }
 0x154   : > { %816 = vrot.lane.b32.xlu0 %v485_v22, %s1936_s26  ;;  %1573 = vmatprep.mubr.msk.f32.mxu1 %vm1934_vm0, %v1933_v0 }
 0x156   : > { %v644_v24 = vpop.f32.mrf.mxu0 }
 0x157   : > { %1159 = vrot.lane.b32.xlu1 %v485_v22, %s1937_s23  ;;  %v645_v25 = vadd.f32 %v1483_v23, %v644_v24 }
 0x158   : > { %1161 = vrot.lane.b32.xlu0 %v564_v19, %s1937_s23  ;;  %v1565_v26 = vpop.f32.mrf.mxu0 }
 0x159   : > { %1572 = vmatpush3.msra.mxu1 %v645_v25 }
 0x15a   : > { %1581 = vmatprep.subr.mxu1 %v1933_v0 }
 0x1c1   : > { %v819_v27 = vpop.permute.xlu0 %818  ;;  %v991_v28 = vpop.permute.xlu1 %990 }
 0x1c2   : > { %1577 = vmatpush3.xpose.msk.msra.mxu0 %vm654_vm2, %v819_v27 }
 0x1c3   : > { %1586 = vmatprep.subr.mxu0 %v1933_v0 }
 0x1c5   : > { %v989_v30 = vpop.permute.xlu1 %988 }
 0x1c6   : > { %v817_v29 = vpop.permute.xlu0 %816 }
 0x1c7   : > { %1579 = vmatmul.mubr.msk.f32.vlgmr.msra.gmra.mxu0 %vm654_vm2, %v817_v29 }
 0x1c8   : > { %1587 = vmatpush3.xpose.msk.msra.mxu0 %vm654_vm2, %v991_v28  ;;  %1588 = vmatprep.mubr.msk.f32.mxu0 %vm1934_vm0, %v1933_v0 }
 0x1c9   : > { %1596 = vmatprep.subr.mxu0 %v1933_v0  ;;  %v1160_v32 = vpop.permute.xlu1 %1159 }
 0x1ca   : > { %v1162_v31 = vpop.permute.xlu0 %1161 }
 0x1cb   : > { %1589 = vmatmul.mubr.msk.f32.vlgmr.msra.gmra.mxu0 %vm654_vm2, %v989_v30 }
 0x1cc   : > { %1597 = vmatpush3.xpose.msk.msra.mxu0 %vm654_vm2, %v1162_v31  ;;  %1598 = vmatprep.mubr.msk.f32.mxu0 %vm1934_vm0, %v1933_v0 }
 0x1cf   : > { %1599 = vmatmul.mubr.msk.f32.vlgmr.msra.gmra.mxu0 %vm654_vm2, %v1160_v32 }
 0x213   : > { %v727_v34 = vpop.f32.mrf.mxu1 }
 0x214   : > { %v728_v35 = vadd.f32 %v1485_v33, %v727_v34 }
 0x215   : > { %v1570_v36 = vpop.f32.mrf.mxu1 }
 0x216   : > { %v731_v37 = vsel %vm654_vm2, %v728_v35, -inf }
 0x217   : > { %732 = vmax.xlane.f32.xlu0 %v731_v37 }
 0x287   : > { %v890_v38 = vpop.f32.mrf.mxu0 }
 0x288   : > { %v891_v39 = vadd.f32 %v1485_v33, %v890_v38 }
 0x289   : > { %v1580_v40 = vpop.f32.mrf.mxu0 }
 0x28a   : > { %v894_v41 = vsel %vm654_vm2, %v891_v39, -inf }
 0x28b   : > { %895 = vmax.xlane.f32.xlu1 %v894_v41  ;;  %v1062_v42 = vpop.f32.mrf.mxu0 }
 0x28c   : > { %v1063_v43 = vadd.f32 %v1485_v33, %v1062_v42 }
 0x28d   : > { %v1590_v44 = vpop.f32.mrf.mxu0 }
 0x28e   : > { %v1066_v45 = vsel %vm654_vm2, %v1063_v43, -inf }
 0x28f   : > { %1067 = vmax.xlane.f32.xlu0 %v1066_v45  ;;  %v1233_v46 = vpop.f32.mrf.mxu0 }
 0x290   : > { %v1234_v47 = vadd.f32 %v1485_v33, %v1233_v46 }
 0x291   : > { %v1600_v48 = vpop.f32.mrf.mxu0 }
 0x292   : > { %v1237_v49 = vsel %vm654_vm2, %v1234_v47, -inf }
 0x293   : > { %1238 = vmax.xlane.f32.xlu0 %v1237_v49 }
 0x29c   : > { %904 = vrot.lane.b32.xlu1 %v645_v25, %s1936_s26  ;;  %s1848_s26 = scalar_lea.vmem %s1347_s11, 128 }
 0x29d   : > { %p1849_p12 = scmp.ne.s32.totalorder %s1347_s11, %s1848_s26 }
 0x29f   : > { %p1850_p5 = pnand %p1849_p12, %p2341_p0 }
 0x2a0   : > { %v733_v50 = vpop.xlane.xlu0 %732  ;;  %1246 = vrot.lane.b32.xlu1 %v645_v25, %s1937_s23  ;;  %s1941_s23 = smov [#allocation12]  }
 0x2a1   : > { %v734_v51 = vsub.f32 %v728_v35, %v733_v50  ;;  %p1851_p3 = pneg %p1850_p5  ;;  %s1852_s9 = sshll.u32 %s1941_s23, 4  ;;  %s1853_s9 = int_to_ptr.vmem [resolvable:$false] %s1852_s9 }
 0x2a2   : > { %s1854_s14 = scalar_lea.vmem %s1853_s9, 256  ;;  %p1855_p7 = scmp.lt.s32.totalorder %s1347_s11, %s1853_s9 }
 0x2a3   : > { %v735_v52 = vmul.f32 1.442695, %v734_v51  ;;  %p1856_p9 = scmp.lt.s32.totalorder %s1854_s14, %s1848_s26 }
 0x2a5   : > { %1698 = vpow2.f32 %v735_v52  ;;  %p1857_p8 = por %p1856_p9, %p1855_p7 }
 0x2a7   : > { %p1858_p10 = pnand %p1857_p8, %p1851_p3 }
 0x2a9   : > { %1075 = vrot.lane.b32.xlu0 %v645_v25, %s1935_s22  ;;  %s1333_s22 = scalar_lea.sflag [#allocation5], %s2151_s20 }
 0x2b2   : > { %v1699_v53 = vpop.eup %1698 }
 0x2b3   : > { %1574 = vmatmul.mubr.msk.f32.vlgmr.msra.gmra.mxu1 %vm654_vm2, %v1699_v53  ;;  %v737_v6 = vsel %vm654_vm2, %v1699_v53, 0.0 }
 0x2b4   : > { %1583 = vmatprep.mubr.msk.f32.mxu1 %vm1934_vm0, %v1933_v0 }
 0x314   : > { %v896_v54 = vpop.xlane.xlu1 %895 }
 0x315   : > { %v897_v55 = vsub.f32 %v891_v39, %v896_v54 }
 0x317   : > { %v898_v56 = vmul.f32 1.442695, %v897_v55 }
 0x318   : > { %v905_v57 = vpop.permute.xlu1 %904  ;;  %v1068_v58 = vpop.xlane.xlu0 %1067 }
 0x319   : > { %1700 = vpow2.f32 %v898_v56  ;;  %v1069_v59 = vsub.f32 %v1063_v43, %v1068_v58  ;;  %1582 = vmatpush3.msra.mxu1 %v905_v57 }
 0x31a   : > { %1591 = vmatprep.subr.mxu1 %v1933_v0 }
 0x31b   : > { %v1070_v60 = vmul.f32 1.442695, %v1069_v59 }
 0x31c   : > { %v1239_v61 = vpop.xlane.xlu0 %1238  ;;  %v1247_v5 = vpop.permute.xlu1 %1246 }
 0x31d   : > { %1702 = vpow2.f32 %v1070_v60  ;;  %v1240_v62 = vsub.f32 %v1234_v47, %v1239_v61 }
 0x31f   : > { %v1241_v63 = vmul.f32 1.442695, %v1240_v62 }
 0x320   : > { %v1076_v2 = vpop.permute.xlu0 %1075 }
 0x321   : > { %1704 = vpow2.f32 %v1241_v63 }
 0x326   : > { %v1701_v1 = vpop.eup %1700 }
 0x327   : > { %1584 = vmatmul.mubr.msk.f32.vlgmr.msra.gmra.mxu1 %vm654_vm2, %v1701_v1  ;;  %v900_v3 = vsel %vm654_vm2, %v1701_v1, 0.0 }
 0x328   : > { %1592 = vmatpush3.msra.mxu1 %v1076_v2  ;;  %901 = vadd.xlane.f32.xlu1 %v900_v3 }
 0x329   : > { %1593 = vmatprep.mubr.msk.f32.mxu1 %vm1934_vm0, %v1933_v0  ;;  %1601 = vmatprep.subr.mxu1 %v1933_v0 }
 0x32a   : > { %v1703_v4 = vpop.eup %1702 }
 0x32b   : > { %1594 = vmatmul.mubr.msk.f32.vlgmr.msra.gmra.mxu1 %vm654_vm2, %v1703_v4  ;;  %v1072_v7 = vsel %vm654_vm2, %v1703_v4, 0.0 }
 0x32c   : > { %1602 = vmatpush3.msra.mxu1 %v1247_v5  ;;  %738 = vadd.xlane.f32.xlu1 %v737_v6 }
 0x32d   : > { %1073 = vadd.xlane.f32.xlu0 %v1072_v7  ;;  %1603 = vmatprep.mubr.msk.f32.mxu1 %vm1934_vm0, %v1933_v0 }
 0x32e   : > { %v1705_v8 = vpop.eup %1704 }
 0x32f   : > { %1604 = vmatmul.mubr.msk.f32.vlgmr.msra.gmra.mxu1 %vm654_vm2, %v1705_v8  ;;  %v1243_v9 = vsel %vm654_vm2, %v1705_v8, 0.0 }
 0x331   : > { %1244 = vadd.xlane.f32.xlu0 %v1243_v9 }
 0x373   : > { %v809_v10 = vpop.f32.mrf.mxu1 }
 0x375   : > { %v1575_v11 = vpop.f32.mrf.mxu1 }
 0x3b1   : > { %v902_v12 = vpop.xlane.xlu1 %901 }
 0x3b5   : > { %v739_v13 = vpop.xlane.xlu1 %738 }
 0x3b6   : > { %1706 = vrcp.f32 %v739_v13  ;;  %v1074_v16 = vpop.xlane.xlu0 %1073 }
 0x3b7   : > { %1708 = vrcp.f32 %v902_v12 }
 0x3b8   : > { %1710 = vrcp.f32 %v1074_v16 }
 0x3ba   : > { %v1245_v17 = vpop.xlane.xlu0 %1244 }
 0x3bb   : > { %1712 = vrcp.f32 %v1245_v17 }
 0x3c3   : > { %v1707_v14 = vpop.eup %1706 }
 0x3c4   : > { %v814_v15 = vmul.f32 %v1707_v14, %v809_v10  ;;  %v1709_v0 = vpop.eup %1708 }
 0x3c5   : > { %v1711_v21 = vpop.eup %1710 }
 0x3c6   : > { %815 = vst.msk [vmem:[#allocation2] sm:$0xff] %vm654_vm2, %v814_v15 }
 0x3c8   : > { %v1713_v25 = vpop.eup %1712 }
 0x3e7   : > { %v976_v18 = vpop.f32.mrf.mxu1 }
 0x3e8   : > { %v981_v19 = vmul.f32 %v1709_v0, %v976_v18 }
 0x3e9   : > { %v1585_v20 = vpop.f32.mrf.mxu1 }
 0x3ea   : > { %983 = vrot.lane.b32.xlu0 %v981_v19, %s1938_s17 }
 0x3eb   : > { %v1147_v22 = vpop.f32.mrf.mxu1 }
 0x3ec   : > { %v1152_v23 = vmul.f32 %v1711_v21, %v1147_v22 }
 0x3ed   : > { %v1595_v24 = vpop.f32.mrf.mxu1 }
 0x3ee   : > { %1154 = vrot.lane.b32.xlu1 %v1152_v23, %s1939_s16 }
 0x3ef   : > { %v1318_v26 = vpop.f32.mrf.mxu1 }
 0x3f0   : > { %v1323_v27 = vmul.f32 %v1713_v25, %v1318_v26 }
 0x3f1   : > { %v1605_v28 = vpop.f32.mrf.mxu1 }
 0x3f2   : > { %1325 = vrot.lane.b32.xlu1 %v1323_v27, %s1940_s13 }
 0x45c   : > { %v984_v29 = vpop.permute.xlu0 %983 }
 0x45d   : > { %987 = vst.msk [vmem:[#allocation2] sm:$0xff] %vm986_vm3, %v984_v29 }
 0x460   : > { %v1155_v30 = vpop.permute.xlu1 %1154 }
 0x461   : > { %1158 = vst.msk [vmem:[#allocation2] sm:$0xff] %vm1157_vm4, %v1155_v30 }
 0x464   : > { %v1326_v31 = vpop.permute.xlu1 %1325 }
 0x465   : > { %1329 = vst.msk [vmem:[#allocation2] sm:$0xff] %vm1328_vm5, %v1326_v31 }
 0x46c   : > { %v1330_v32 = vld [vmem:[#allocation2] sm:$0xff] }
 0x46d   : > { %1331 = vst.msk [vmem:[%s397_s3] sm:$0xff] %vm411_vm1, %v1330_v32 }
 0x46e   : > { %1861 = shalt.err (!%p1858_p10)
}
 0x46f   : > { %s1862_s4 = scalar_lea.hbm %s2270_s2, 128  ;;  %s1866_s17 = scalar_lea.hbm %s2316_s8, 256 }
 0x470   : > { %p1863_p13 = scmp.ne.s32.totalorder %s2270_s2, %s1862_s4  ;;  %p1867_p2 = scmp.lt.s32.totalorder %s2270_s2, %s2316_s8 }
 0x471   : > { %p1868_p4 = scmp.lt.s32.totalorder %s1866_s17, %s1862_s4 }
 0x472   : > { %p1864_p1 = pnand %p1863_p13, %p2341_p0 }
 0x473   : > { %p1869_p6 = por %p1868_p4, %p1867_p2 }
 0x474   : > { %p1865_p11 = pneg %p1864_p1 }
 0x476   : > { %p1870_p12 = pnand %p1869_p6, %p1865_p11 }
 0x478   : > { %1873 = shalt.err (!%p1870_p12)
}
 0x479   : > { %1622 = dma.vmem_to_hbm [thread:$0]  (%p2341_p0), %s1347_s11, 128, %s2270_s2, %s1333_s22  }
 0x47a PF: > { %s1358_s19 = sand.u32 1, %s1912_s27   ;;  %p2342_p5 = scmp.ne.s32.totalorder %s2325_s12, 0 }
 0x47b   : > { %p2343_p3 = scmp.ge.s32.totalorder %s1924_s30, 2  ;;  %s1359_s3 = scalar_lea.sflag [#allocation5], %s1358_s19 }
 0x47d   : > { %p1642_p7 = pnand %p2343_p3, %p2342_p5 }
 0x47f   : > { %p1643_p9 = pneg %p1642_p7 }
 0x481   : > { %1907 = dma.done.wait (%p1643_p9), %s1359_s3, 128  }
 0x482   : > { %1909 = vsyncadd (%p1643_p9), %s1359_s3, 4294967168  ;;  %p25_p8 = scmp.ge.s32.totalorder %s2067_s18, 4   ;;  %s2344_s27 = smov %s1916_s28 }
 0x483   : > { %s2345_s28 = smov %s1920_s29  ;;  %s2346_s29 = smov %s2077_s24 }
 0x484   : > { %s2347_s30 = smov %s2067_s18  ;;  %27 = sbr.rel (!%p25_p8) target bundleno = 12 (0xc), region = 122 }
 0x489   :  { %1364 = vsyncpa [#allocation4], 1 }
 0x48a   :  { %1366 = vsyncpa [#allocation4 + $0x1], 1 }
 0x48b   :  { %1367 = vsyncpa [#allocation7], 1 }
 0x48c   :  { %1369 = vsyncpa [#allocation7 + $0x1], 1 }
 0x48d   :  { %1370 = vsyncpa [#allocation10], 1 }
 0x48e   :  { %1371 = vsyncpa [#allocation5], 1 }
 0x48f   :  { %1373 = vsyncpa [#allocation5 + $0x1], 1 }

</bundles_post_ra>
